<compile_context>
chip_gen: v7x
topology: tpu7x:2x2x1
jax: 0.10.0
libtpu: 0.0.40
codegen_flags: <defaults>
</compile_context>

<pallas_src>
import functools

import jax
import jax.numpy as jnp
from jax.experimental import pallas as pl
from jax.experimental.pallas import tpu as pltpu

_LANE = 128          # vreg lane width
_SUBLANE_BF16 = 16   # bf16 rows per vreg (sublane packing)


def _round_up(x, m):
    return -(-x // m) * m


def _vmem_budget_bytes():
    """Per-kernel VMEM budget with headroom (v5e/v6e: 128 MiB, v7x: 64 MiB)."""
    try:
        cap = int(pltpu.get_tpu_info().vmem_capacity_bytes)
    except Exception:
        cap = 64 * 1024 * 1024      # conservative fallback (v7x-sized)
    return max(int(cap * 0.80), 16 * 1024 * 1024)


def _trunk_vmem_bytes(tm, h):
    emb_in = 2 * tm * h * 2                 # bf16, double-buffered
    w1 = h * h * 2                          # Buffered(1): one resident copy
    wv = 2 * 8 * max(h, _LANE) * 2
    hid_out = 2 * tm * h * 2
    val_out = 2 * tm * _LANE * 4            # (tm,1) pads to a full lane tile
    return emb_in + w1 + wv + hid_out + val_out


def _vocab_vmem_bytes(tm, tv, h, emit_logits):
    hid_in = 2 * tm * h * 2
    lab_in = 2 * tm * _LANE * 4
    wlm_in = 2 * h * tv * 2
    logits_out = 2 * tm * tv * 2 if emit_logits else 0
    lp_out = 2 * tm * _LANE * 4
    scratch = 3 * tm * _LANE * 4            # m / l / t running stats (padded)
    return hid_in + lab_in + wlm_in + logits_out + lp_out + scratch


def _pick_tiles(n, h, v, *, emit_logits, budget, tm_pref, tv_pref):
    """tm multiple of 16 (bf16 sublanes), tv multiple of 128 (lanes)."""
    tv = min(_round_up(tv_pref, _LANE), _round_up(v, _LANE))
    tm = min(_round_up(tm_pref, _SUBLANE_BF16), _round_up(n, _SUBLANE_BF16))
    # Keep >= 2 row tiles when there is enough work so the "parallel" row
    # axis can be sharded across v7x's two TensorCores.
    if n >= 512:
        tm = min(tm, _round_up(-(-n // 2), _SUBLANE_BF16))

    def fits(tm_, tv_):
        return max(_trunk_vmem_bytes(tm_, h),
                   _vocab_vmem_bytes(tm_, tv_, h, emit_logits)) <= budget

    while tm > _SUBLANE_BF16 and not fits(tm, tv):
        tm = _round_up(tm // 2, _SUBLANE_BF16)
    while tv > _LANE and not fits(tm, tv):
        tv = _round_up(tv // 2, _LANE)
    return tm, tv


# ----------------------------------------------------------------------------
# Kernel 1: trunk (emb @ W1 -> tanh) + value head.  Per row tile.
# ----------------------------------------------------------------------------
def _trunk_kernel(emb_ref, w1_ref, wv_ref, hid_ref, val_ref):
    # bf16 x bf16 MXU matmul with f32 accumulation; tanh stays in f32 (EUP).
    h_f32 = jnp.tanh(jnp.dot(emb_ref[...], w1_ref[...],
                             preferred_element_type=jnp.float32))
    hid_ref[...] = h_f32.astype(hid_ref.dtype)
    # Value head: 1-wide output -> VPU lane reduction, not a 1-col MXU matmul.
    val_ref[...] = jnp.sum(h_f32 * wv_ref[...].astype(jnp.float32),
                           axis=-1, keepdims=True)


# ----------------------------------------------------------------------------
# Kernel 2: lm_head vocab loop.  grid = (row tiles, vocab tiles);
# online log-softmax stats + target-logit gather, optional bf16 logits out.
# ----------------------------------------------------------------------------
def _make_vocab_kernel(tv, v_actual, mask_vocab, emit_logits):
    def kernel(hid_ref, labels_ref, wlm_ref, *refs):
        if emit_logits:
            logits_ref, logprob_ref, m_sc, l_sc, t_sc = refs
        else:
            logprob_ref, m_sc, l_sc, t_sc = refs
        j = pl.program_id(1)

        @pl.when(j == 0)
        def _init():
            m_sc[...] = jnp.full(m_sc.shape, -jnp.inf, dtype=m_sc.dtype)
            l_sc[...] = jnp.zeros(l_sc.shape, dtype=l_sc.dtype)
            t_sc[...] = jnp.zeros(t_sc.shape, dtype=t_sc.dtype)

        # lm_head on this vocab tile (bf16 x bf16 -> f32 accumulate on MXU).
        logits_blk = jnp.dot(hid_ref[...], wlm_ref[...],
                             preferred_element_type=jnp.float32)
        if emit_logits:
            logits_ref[...] = logits_blk.astype(logits_ref.dtype)

        col = (jax.lax.broadcasted_iota(jnp.int32, logits_blk.shape, 1)
               + j * tv)
        if mask_vocab:
            # Padded vocab columns must not pollute the logsumexp.
            stat_blk = jnp.where(col < v_actual, logits_blk, -jnp.inf)
        else:
            stat_blk = logits_blk

        # Online (flash-style) log-softmax statistics across vocab tiles.
        m_prev = m_sc[...]
        m_new = jnp.maximum(m_prev, jnp.max(stat_blk, axis=-1, keepdims=True))
        alpha = jnp.exp(m_prev - m_new)
        l_sc[...] = alpha * l_sc[...] + jnp.sum(jnp.exp(stat_blk - m_new),
                                                axis=-1, keepdims=True)
        m_sc[...] = m_new

        # Target-logit pick (labels are in [0, V) so padded cols never match).
        t_sc[...] += jnp.sum(
            jnp.where(col == labels_ref[...], logits_blk, 0.0),
            axis=-1, keepdims=True)

        @pl.when(j == pl.num_programs(1) - 1)
        def _fin():
            logprob_ref[...] = t_sc[...] - (m_sc[...] + jnp.log(l_sc[...]))

    return kernel


def actor_lm_heads(emb, labels, w1, wlm, wv, *, emit_logits,
                   tm_pref=512, tv_pref=1024, vmem_budget=None):
    """emb:(N,H) bf16, labels:(N,1) i32, w1:(H,H), wlm:(H,V), wv:(1,H) bf16.

    Returns (logits (N,V) bf16 or None, values (N,) f32, log_probs (N,) f32).
    """
    n, h = emb.shape
    v = wlm.shape[1]
    budget = _vmem_budget_bytes() if vmem_budget is None else vmem_budget
    tm, tv = _pick_tiles(n, h, v, emit_logits=emit_logits, budget=budget,
                         tm_pref=tm_pref, tv_pref=tv_pref)
    n_pad = _round_up(n, tm)
    v_pad = _round_up(v, tv)

    if n_pad != n:
        emb = jnp.pad(emb, ((0, n_pad - n), (0, 0)))
        labels = jnp.pad(labels, ((0, n_pad - n), (0, 0)))
    if v_pad != v:
        wlm = jnp.pad(wlm, ((0, 0), (0, v_pad - v)))

    rows = n_pad // tm
    vts = v_pad // tv

    # ---- kernel 1: trunk + value head ---------------------------------------
    trunk_cost = pl.CostEstimate(
        flops=2 * n_pad * h * h + 2 * n_pad * h,
        transcendentals=n_pad * h,
        bytes_accessed=2 * 2 * n_pad * h + 2 * h * h + 4 * n_pad)
    hidden, values = pl.pallas_call(
        _trunk_kernel,
        out_shape=(jax.ShapeDtypeStruct((n_pad, h), jnp.bfloat16),
                   jax.ShapeDtypeStruct((n_pad, 1), jnp.float32)),
        grid=(rows,),
        in_specs=[
            pl.BlockSpec((tm, h), lambda i: (i, 0)),                    # emb
            pl.BlockSpec((h, h), lambda i: (0, 0),
                         pipeline_mode=pl.Buffered(1)),                 # W1 (resident, single buffer)
            pl.BlockSpec((1, h), lambda i: (0, 0)),                     # value-head row
        ],
        out_specs=(pl.BlockSpec((tm, h), lambda i: (i, 0)),
                   pl.BlockSpec((tm, 1), lambda i: (i, 0))),
        compiler_params=pltpu.CompilerParams(
            dimension_semantics=("parallel",),
            vmem_limit_bytes=budget),
        cost_estimate=trunk_cost,
    )(emb, w1, wv)

    # ---- kernel 2: lm_head vocab loop ---------------------------------------
    kernel = _make_vocab_kernel(tv, v, v_pad != v, emit_logits)
    out_shape = []
    out_specs = []
    if emit_logits:
        out_shape.append(jax.ShapeDtypeStruct((n_pad, v_pad), jnp.bfloat16))
        out_specs.append(pl.BlockSpec((tm, tv), lambda i, j: (i, j)))
    # (tm,1) log-prob output is lane-sparse but carries only ~N*4 bytes total.
    out_shape.append(jax.ShapeDtypeStruct((n_pad, 1), jnp.float32))
    out_specs.append(pl.BlockSpec((tm, 1), lambda i, j: (i, 0)))

    vocab_cost = pl.CostEstimate(
        flops=2 * n_pad * h * v_pad,
        transcendentals=n_pad * v_pad,
        bytes_accessed=(rows * h * v_pad * 2 + n_pad * h * 2
                        + (n_pad * v_pad * 2 if emit_logits else 0)
                        + n_pad * 8))
    outs = pl.pallas_call(
        kernel,
        out_shape=tuple(out_shape),
        grid=(rows, vts),
        in_specs=[
            pl.BlockSpec((tm, h), lambda i, j: (i, 0)),   # hidden (DMA only when i changes)
            pl.BlockSpec((tm, 1), lambda i, j: (i, 0)),   # labels
            pl.BlockSpec((h, tv), lambda i, j: (0, j)),   # lm_head tile (streamed)
        ],
        out_specs=tuple(out_specs),
        scratch_shapes=[
            pltpu.VMEM((tm, 1), jnp.float32),   # running max
            pltpu.VMEM((tm, 1), jnp.float32),   # running sum-exp
            pltpu.VMEM((tm, 1), jnp.float32),   # target logit
        ],
        compiler_params=pltpu.CompilerParams(
            dimension_semantics=("parallel", "arbitrary"),
            vmem_limit_bytes=budget),
        cost_estimate=vocab_cost,
    )(hidden, labels, wlm)

    if emit_logits:
        logits_pad, log_probs = outs
        logits = logits_pad[:n, :v]
    else:
        log_probs = outs[0] if isinstance(outs, (tuple, list)) else outs
        logits = None
    return logits, values[:n, 0], log_probs[:n, 0]


# ----------------------------------------------------------------------------
# Synthetic Actor (with value head) in JAX; Pallas for the hot path.
# ----------------------------------------------------------------------------
class ActorPallas:
    def __init__(self, vocab_size, hidden_size, max_pos, key,
                 tm_pref=512, tv_pref=1024, tm_fast_pref=1024):
        k_tok, k_pos, k_w1, k_lm, k_v = jax.random.split(key, 5)
        self.vocab_size = vocab_size
        self.hidden_size = hidden_size
        self.tm_pref = tm_pref
        self.tv_pref = tv_pref
        self.tm_fast_pref = tm_fast_pref       # larger tm for the no-logits path
        self._vmem_budget = _vmem_budget_bytes()
        # Model weights in bf16 (bf16=True in the reference); value head
        # initialized N(0, 1/(hidden_size + 1)) as in the reference.
        self.tok_emb = (jax.random.normal(k_tok, (vocab_size, hidden_size))
                        * 0.02).astype(jnp.bfloat16)
        self.pos_emb = (jax.random.normal(k_pos, (max_pos, hidden_size))
                        * 0.02).astype(jnp.bfloat16)
        self.w1 = (jax.random.normal(k_w1, (hidden_size, hidden_size))
                   * 0.05).astype(jnp.bfloat16)   # toy trunk stand-in
        self.w_lm = (jax.random.normal(k_lm, (hidden_size, vocab_size))
                     * 0.05).astype(jnp.bfloat16)
        self.w_value = (jax.random.normal(k_v, (1, hidden_size))
                        * (1.0 / (hidden_size + 1))).astype(jnp.bfloat16)
        self.has_value_head = True
        self.packing_samples = False

    def _heads(self, emb2d, labels2d, *, emit_logits):
        tm_pref = self.tm_pref if emit_logits else self.tm_fast_pref
        return actor_lm_heads(emb2d, labels2d, self.w1, self.w_lm,
                              self.w_value, emit_logits=emit_logits,
                              tm_pref=tm_pref, tv_pref=self.tv_pref,
                              vmem_budget=self._vmem_budget)

    @functools.partial(jax.jit, static_argnums=(0, 3, 4))
    def forward(self, sequences, attention_mask, num_actions=None,
                return_output=False):
        B, S = sequences.shape
        H, V = self.hidden_size, self.vocab_size

        # position_ids = attention_mask.cumsum(-1) - 1; masked_fill(mask==0, 1)
        mask = attention_mask.astype(jnp.int32)
        position_ids = jnp.cumsum(mask, axis=-1) - 1
        position_ids = jnp.where(mask == 0, 1, position_ids)

        if (num_actions is not None) and (not return_output):
            # RL fast path: only the last num_actions positions feed
            # action_log_probs.  Valid here because the toy trunk is
            # position-local (no attention); no logits are materialized.
            ctx_tok = sequences[:, S - 1 - num_actions:S - 1]
            ctx_pos = position_ids[:, S - 1 - num_actions:S - 1]
            labels = sequences[:, S - num_actions:S]
            emb = self.tok_emb[ctx_tok] + self.pos_emb[ctx_pos]     # bf16
            n = B * num_actions
            _, _, log_probs = self._heads(
                emb.reshape(n, H),
                labels.reshape(n, 1).astype(jnp.int32),
                emit_logits=False)
            return log_probs.reshape(B, num_actions)

        # Full forward: logits + values + per-position log-probs.
        emb = self.tok_emb[sequences] + self.pos_emb[position_ids]  # (B,S,H) bf16
        labels = jnp.concatenate(
            [sequences[:, 1:], jnp.zeros((B, 1), dtype=sequences.dtype)],
            axis=1)                                                 # dummy at S-1
        n = B * S
        logits2d, values1d, log_probs1d = self._heads(
            emb.reshape(n, H),
            labels.reshape(n, 1).astype(jnp.int32),
            emit_logits=True)
        logits = logits2d.reshape(B, S, V)             # bf16
        values = values1d.reshape(B, S)                # f32
        log_probs = log_probs1d.reshape(B, S)[:, :-1]  # drop dummy last column

        output = {"logits": logits, "values": values}
        if num_actions is None:
            assert return_output
            return output

        action_log_probs = log_probs[:, -num_actions:]
        if self.has_value_head and return_output:
            output["values"] = values[:, :-1][:, -num_actions:]
        if return_output:
            return action_log_probs, output
        return action_log_probs


# ----------------------------------------------------------------------------
# Reference (pure jnp, f32) for a sanity check of the Pallas pieces.
# ----------------------------------------------------------------------------
def _ref_forward(actor, sequences, attention_mask, num_actions):
    mask = attention_mask.astype(jnp.int32)
    pos = jnp.cumsum(mask, axis=-1) - 1
    pos = jnp.where(mask == 0, 1, pos)
    emb = (actor.tok_emb[sequences] + actor.pos_emb[pos]).astype(jnp.float32)
    hidden = jnp.tanh(emb @ actor.w1.astype(jnp.float32))
    logits = hidden @ actor.w_lm.astype(jnp.float32)
    values = hidden @ actor.w_value.astype(jnp.float32)[0]
    lp = jax.nn.log_softmax(logits[:, :-1, :], axis=-1)
    labels = sequences[:, 1:]
    log_probs = jnp.take_along_axis(lp, labels[..., None], axis=-1)[..., 0]
    return (log_probs[:, -num_actions:],
            values[:, :-1][:, -num_actions:],
            logits)


if __name__ == "__main__":
    key = jax.random.PRNGKey(0)
    k_model, k_seq = jax.random.split(key)

    # V=500 / S=60 are deliberately NOT tile multiples so the row/vocab padding
    # and padded-column masking paths are exercised.
    B, S, H, V = 2, 60, 128, 500
    num_actions = 16

    # Small tile prefs so the toy shapes exercise the 2-D grid and padding;
    # defaults (512 / 1024 / 1024) target real shapes.
    actor = ActorPallas(vocab_size=V, hidden_size=H, max_pos=S, key=k_model,
                        tm_pref=64, tv_pref=256, tm_fast_pref=64)

    sequences = jax.random.randint(k_seq, (B, S), 0, V, dtype=jnp.int32)
    attention_mask = jnp.ones((B, S), dtype=jnp.int32)
    attention_mask = attention_mask.at[0, :5].set(0)   # left padding, sample 0

    # Path 1: return_output=True -> full logits + values + action log-probs.
    action_log_probs, output = actor.forward(
        sequences, attention_mask, num_actions, True)
    # Path 2: return_output=False -> only the last num_actions positions.
    action_log_probs_fast = actor.forward(
        sequences, attention_mask, num_actions, False)
    jax.block_until_ready((action_log_probs, action_log_probs_fast, output))

    ref_lp, ref_vals, ref_logits = _ref_forward(
        actor, sequences, attention_mask, num_actions)

    assert action_log_probs.shape == (B, num_actions)
    assert action_log_probs_fast.shape == (B, num_actions)
    assert output["values"].shape == (B, num_actions)
    assert output["logits"].shape == (B, S, V)
    assert jnp.allclose(action_log_probs, ref_lp, atol=5e-3, rtol=5e-3)
    assert jnp.allclose(action_log_probs_fast, ref_lp, atol=5e-3, rtol=5e-3)
    assert jnp.allclose(output["values"], ref_vals, atol=3e-3, rtol=3e-3)
    assert jnp.allclose(output["logits"].astype(jnp.float32), ref_logits,
                        atol=2e-2, rtol=2e-2)   # logits are bf16 by design

    # TODO(synk): the wrapped HF causal-LM transformer (attention stack),
    # generate(), ring-attention, packed-sample, LoRA and 4-bit paths are out
    # of scope; a tanh-dense trunk stands in for the transformer body.
    print("KERNEL_OK")
</pallas_src>

<mosaic_0001>
module attributes {stable_mosaic.version = 11 : i64} {
  func.func @_trunk_kernel(%arg0: i32, %arg1: memref<64x128xbf16, #tpu.memory_space<vmem>>, %arg2: memref<128x128xbf16, #tpu.memory_space<vmem>>, %arg3: memref<1x128xbf16, #tpu.memory_space<vmem>>, %arg4: memref<64x128xbf16, #tpu.memory_space<vmem>>, %arg5: memref<64x1xf32, #tpu.memory_space<vmem>>) attributes {dimension_semantics = [#tpu.dimension_semantics<parallel>], iteration_bounds = array<i64: 2>, scalar_prefetch = 0 : i64, scratch_operands = 0 : i64, tpu.core_type = #tpu.core_type<tc>, window_params = [{transform_indices = @transform_0, window_bounds = array<i64: 64, 128>}, {pipeline_mode = #tpu.pipeline_mode<synchronous>, transform_indices = @transform_1, window_bounds = array<i64: 128, 128>}, {pipeline_mode = #tpu.pipeline_mode<synchronous>, transform_indices = @transform_2, window_bounds = array<i64: 1, 128>}, {transform_indices = @transform_3, window_bounds = array<i64: 64, 128>}, {transform_indices = @transform_4, window_bounds = array<i64: 64, 1>}]} {
    %c0 = arith.constant 0 : index
    %c0_0 = arith.constant 0 : index
    %0 = vector.load %arg1[%c0, %c0_0] : memref<64x128xbf16, #tpu.memory_space<vmem>>, vector<64x128xbf16>
    %c0_1 = arith.constant 0 : index
    %c0_2 = arith.constant 0 : index
    %1 = vector.load %arg2[%c0_1, %c0_2] : memref<128x128xbf16, #tpu.memory_space<vmem>>, vector<128x128xbf16>
    %cst = arith.constant dense<0.000000e+00> : vector<64x128xf32>
    %2 = tpu.matmul %0, %1, %cst {dimension_numbers = #tpu.dot_dimension_numbers<[1], [0], [0], [1], [0, 0, 1, 1], [], []>} : vector<64x128xbf16>, vector<128x128xbf16>, vector<64x128xf32> -> vector<64x128xf32>
    %3 = math.tanh %2 : vector<64x128xf32>
    %4 = arith.truncf %3 : vector<64x128xf32> to vector<64x128xbf16>
    %c0_3 = arith.constant 0 : index
    %c0_4 = arith.constant 0 : index
    %5 = vector.load %arg4[%c0_3, %c0_4] : memref<64x128xbf16, #tpu.memory_space<vmem>>, vector<64x128xbf16>
    tpu.vector_store %arg4[%c0_3, %c0_4], %4 {strides = array<i32>} : memref<64x128xbf16, #tpu.memory_space<vmem>>, vector<64x128xbf16>,
    %c0_5 = arith.constant 0 : index
    %c0_6 = arith.constant 0 : index
    %6 = vector.load %arg3[%c0_5, %c0_6] : memref<1x128xbf16, #tpu.memory_space<vmem>>, vector<1x128xbf16>
    %7 = arith.extf %6 : vector<1x128xbf16> to vector<1x128xf32>
    %8 = vector.broadcast %7 : vector<1x128xf32> to vector<64x128xf32>
    %9 = arith.mulf %3, %8 : vector<64x128xf32>
    %cst_7 = arith.constant dense<0.000000e+00> : vector<64xf32>
    %10 = vector.multi_reduction <add>, %9, %cst_7 [1] : vector<64x128xf32> to vector<64xf32>
    %11 = vector.shape_cast %10 : vector<64xf32> to vector<64x1xf32>
    %c0_8 = arith.constant 0 : index
    %c0_9 = arith.constant 0 : index
    %12 = vector.load %arg5[%c0_8, %c0_9] : memref<64x1xf32, #tpu.memory_space<vmem>>, vector<64x1xf32>
    tpu.vector_store %arg5[%c0_8, %c0_9], %11 {strides = array<i32>} : memref<64x1xf32, #tpu.memory_space<vmem>>, vector<64x1xf32>,
    return
  }
  func.func @transform_0(%arg0: i32) -> (i32, i32) {
    %c0_i32 = arith.constant 0 : i32
    %c0_i32_0 = arith.constant 0 : i32
    return %arg0, %c0_i32 : i32, i32
  }
  func.func @transform_1(%arg0: i32) -> (i32, i32) {
    %c0_i32 = arith.constant 0 : i32
    %c0_i32_0 = arith.constant 0 : i32
    %c0_i32_1 = arith.constant 0 : i32
    return %c0_i32, %c0_i32_0 : i32, i32
  }
  func.func @transform_2(%arg0: i32) -> (i32, i32) {
    %c0_i32 = arith.constant 0 : i32
    %c0_i32_0 = arith.constant 0 : i32
    %c0_i32_1 = arith.constant 0 : i32
    return %c0_i32, %c0_i32_0 : i32, i32
  }
  func.func @transform_3(%arg0: i32) -> (i32, i32) {
    %c0_i32 = arith.constant 0 : i32
    %c0_i32_0 = arith.constant 0 : i32
    return %arg0, %c0_i32 : i32, i32
  }
  func.func @transform_4(%arg0: i32) -> (i32, i32) {
    %c0_i32 = arith.constant 0 : i32
    %c0_i32_0 = arith.constant 0 : i32
    return %arg0, %c0_i32 : i32, i32
  }
}

module attributes {stable_mosaic.version = 11 : i64} {
  func.func @kernel(%arg0: i32, %arg1: i32, %arg2: memref<64x128xbf16, #tpu.memory_space<vmem>>, %arg3: memref<64x1xi32, #tpu.memory_space<vmem>>, %arg4: memref<128x256xbf16, #tpu.memory_space<vmem>>, %arg5: memref<64x256xbf16, #tpu.memory_space<vmem>>, %arg6: memref<64x1xf32, #tpu.memory_space<vmem>>, %arg7: memref<64x1xf32, #tpu.memory_space<vmem>>, %arg8: memref<64x1xf32, #tpu.memory_space<vmem>>, %arg9: memref<64x1xf32, #tpu.memory_space<vmem>>) attributes {dimension_semantics = [#tpu.dimension_semantics<parallel>, #tpu.dimension_semantics<arbitrary>], iteration_bounds = array<i64: 2, 2>, scalar_prefetch = 0 : i64, scratch_operands = 3 : i64, tpu.core_type = #tpu.core_type<tc>, window_params = [{transform_indices = @transform_0, window_bounds = array<i64: 64, 128>}, {transform_indices = @transform_1, window_bounds = array<i64: 64, 1>}, {transform_indices = @transform_2, window_bounds = array<i64: 128, 256>}, {transform_indices = @transform_3, window_bounds = array<i64: 64, 256>}, {transform_indices = @transform_4, window_bounds = array<i64: 64, 1>}]} {
    %c0_i32 = arith.constant 0 : i32
    %0 = arith.cmpi eq, %arg1, %c0_i32 : i32
    %1 = arith.extui %0 : i1 to i32
    %c0_i32_0 = arith.constant 0 : i32
    %2 = arith.cmpi ne, %1, %c0_i32_0 : i32
    scf.if %2 {
      %cst_26 = arith.constant 0xFF800000 : f32
      %45 = vector.broadcast %cst_26 : f32 to vector<64x1xf32>
      %c0_27 = arith.constant 0 : index
      %c0_28 = arith.constant 0 : index
      %46 = vector.load %arg7[%c0_27, %c0_28] : memref<64x1xf32, #tpu.memory_space<vmem>>, vector<64x1xf32>
      tpu.vector_store %arg7[%c0_27, %c0_28], %45 {strides = array<i32>} : memref<64x1xf32, #tpu.memory_space<vmem>>, vector<64x1xf32>,
      %cst_29 = arith.constant 0.000000e+00 : f32
      %47 = vector.broadcast %cst_29 : f32 to vector<64x1xf32>
      %c0_30 = arith.constant 0 : index
      %c0_31 = arith.constant 0 : index
      %48 = vector.load %arg8[%c0_30, %c0_31] : memref<64x1xf32, #tpu.memory_space<vmem>>, vector<64x1xf32>
      tpu.vector_store %arg8[%c0_30, %c0_31], %47 {strides = array<i32>} : memref<64x1xf32, #tpu.memory_space<vmem>>, vector<64x1xf32>,
      %cst_32 = arith.constant 0.000000e+00 : f32
      %49 = vector.broadcast %cst_32 : f32 to vector<64x1xf32>
      %c0_33 = arith.constant 0 : index
      %c0_34 = arith.constant 0 : index
      %50 = vector.load %arg9[%c0_33, %c0_34] : memref<64x1xf32, #tpu.memory_space<vmem>>, vector<64x1xf32>
      tpu.vector_store %arg9[%c0_33, %c0_34], %49 {strides = array<i32>} : memref<64x1xf32, #tpu.memory_space<vmem>>, vector<64x1xf32>,
    } else {
    }
    %c0 = arith.constant 0 : index
    %c0_1 = arith.constant 0 : index
    %3 = vector.load %arg2[%c0, %c0_1] : memref<64x128xbf16, #tpu.memory_space<vmem>>, vector<64x128xbf16>
    %c0_2 = arith.constant 0 : index
    %c0_3 = arith.constant 0 : index
    %4 = vector.load %arg4[%c0_2, %c0_3] : memref<128x256xbf16, #tpu.memory_space<vmem>>, vector<128x256xbf16>
    %cst = arith.constant dense<0.000000e+00> : vector<64x256xf32>
    %5 = tpu.matmul %3, %4, %cst {dimension_numbers = #tpu.dot_dimension_numbers<[1], [0], [0], [1], [0, 0, 1, 1], [], []>} : vector<64x128xbf16>, vector<128x256xbf16>, vector<64x256xf32> -> vector<64x256xf32>
    %6 = arith.truncf %5 : vector<64x256xf32> to vector<64x256xbf16>
    %c0_4 = arith.constant 0 : index
    %c0_5 = arith.constant 0 : index
    %7 = vector.load %arg5[%c0_4, %c0_5] : memref<64x256xbf16, #tpu.memory_space<vmem>>, vector<64x256xbf16>
    tpu.vector_store %arg5[%c0_4, %c0_5], %6 {strides = array<i32>} : memref<64x256xbf16, #tpu.memory_space<vmem>>, vector<64x256xbf16>,
    %8 = tpu.iota {dimensions = array<i32: 1>} : vector<64x256xi32>
    %c256_i32 = arith.constant 256 : i32
    %9 = arith.muli %arg1, %c256_i32 : i32
    %10 = vector.broadcast %9 : i32 to vector<64x256xi32>
    %11 = arith.addi %8, %10 : vector<64x256xi32>
    %c500_i32 = arith.constant 500 : i32
    %12 = vector.broadcast %c500_i32 : i32 to vector<64x256xi32>
    %13 = arith.cmpi slt, %11, %12 : vector<64x256xi32>
    %cst_6 = arith.constant 0xFF800000 : f32
    %14 = vector.broadcast %cst_6 : f32 to vector<64x256xf32>
    %15 = arith.select %13, %5, %14 : vector<64x256xi1>, vector<64x256xf32>
    %c0_7 = arith.constant 0 : index
    %c0_8 = arith.constant 0 : index
    %16 = vector.load %arg7[%c0_7, %c0_8] : memref<64x1xf32, #tpu.memory_space<vmem>>, vector<64x1xf32>
    %cst_9 = arith.constant dense<0xFF800000> : vector<64xf32>
    %17 = vector.multi_reduction <maximumf>, %15, %cst_9 [1] : vector<64x256xf32> to vector<64xf32>
    %18 = vector.shape_cast %17 : vector<64xf32> to vector<64x1xf32>
    %19 = arith.maximumf %16, %18 : vector<64x1xf32>
    %20 = arith.subf %16, %19 : vector<64x1xf32>
    %21 = math.exp %20 : vector<64x1xf32>
    %c0_10 = arith.constant 0 : index
    %c0_11 = arith.constant 0 : index
    %22 = vector.load %arg8[%c0_10, %c0_11] : memref<64x1xf32, #tpu.memory_space<vmem>>, vector<64x1xf32>
    %23 = arith.mulf %21, %22 : vector<64x1xf32>
    %24 = vector.broadcast %19 : vector<64x1xf32> to vector<64x256xf32>
    %25 = arith.subf %15, %24 : vector<64x256xf32>
    %26 = math.exp %25 : vector<64x256xf32>
    %cst_12 = arith.constant dense<0.000000e+00> : vector<64xf32>
    %27 = vector.multi_reduction <add>, %26, %cst_12 [1] : vector<64x256xf32> to vector<64xf32>
    %28 = vector.shape_cast %27 : vector<64xf32> to vector<64x1xf32>
    %29 = arith.addf %23, %28 : vector<64x1xf32>
    %c0_13 = arith.constant 0 : index
    %c0_14 = arith.constant 0 : index
    %30 = vector.load %arg8[%c0_13, %c0_14] : memref<64x1xf32, #tpu.memory_space<vmem>>, vector<64x1xf32>
    tpu.vector_store %arg8[%c0_13, %c0_14], %29 {strides = array<i32>} : memref<64x1xf32, #tpu.memory_space<vmem>>, vector<64x1xf32>,
    %c0_15 = arith.constant 0 : index
    %c0_16 = arith.constant 0 : index
    %31 = vector.load %arg7[%c0_15, %c0_16] : memref<64x1xf32, #tpu.memory_space<vmem>>, vector<64x1xf32>
    tpu.vector_store %arg7[%c0_15, %c0_16], %19 {strides = array<i32>} : memref<64x1xf32, #tpu.memory_space<vmem>>, vector<64x1xf32>,
    %c0_17 = arith.constant 0 : index
    %c0_18 = arith.constant 0 : index
    %32 = vector.load %arg9[%c0_17, %c0_18] : memref<64x1xf32, #tpu.memory_space<vmem>>, vector<64x1xf32>
    %c0_19 = arith.constant 0 : index
    %c0_20 = arith.constant 0 : index
    %33 = vector.load %arg3[%c0_19, %c0_20] : memref<64x1xi32, #tpu.memory_space<vmem>>, vector<64x1xi32>
    %34 = vector.broadcast %33 : vector<64x1xi32> to vector<64x256xi32>
    %35 = arith.cmpi eq, %11, %34 : vector<64x256xi32>
    %cst_21 = arith.constant 0.000000e+00 : f32
    %36 = vector.broadcast %cst_21 : f32 to vector<64x256xf32>
    %37 = arith.select %35, %5, %36 : vector<64x256xi1>, vector<64x256xf32>
    %cst_22 = arith.constant dense<0.000000e+00> : vector<64xf32>
    %38 = vector.multi_reduction <add>, %37, %cst_22 [1] : vector<64x256xf32> to vector<64xf32>
    %39 = vector.shape_cast %38 : vector<64xf32> to vector<64x1xf32>
    %40 = arith.addf %32, %39 : vector<64x1xf32>
    %c0_23 = arith.constant 0 : index
    %c0_24 = arith.constant 0 : index
    %41 = vector.load %arg9[%c0_23, %c0_24] : memref<64x1xf32, #tpu.memory_space<vmem>>, vector<64x1xf32>
    tpu.vector_store %arg9[%c0_23, %c0_24], %40 {strides = array<i32>} : memref<64x1xf32, #tpu.memory_space<vmem>>, vector<64x1xf32>,
    %c1_i32 = arith.constant 1 : i32
    %42 = arith.cmpi eq, %arg1, %c1_i32 : i32
    %43 = arith.extui %42 : i1 to i32
    %c0_i32_25 = arith.constant 0 : i32
    %44 = arith.cmpi ne, %43, %c0_i32_25 : i32
    scf.if %44 {
      %c0_26 = arith.constant 0 : index
      %c0_27 = arith.constant 0 : index
      %45 = vector.load %arg9[%c0_26, %c0_27] : memref<64x1xf32, #tpu.memory_space<vmem>>, vector<64x1xf32>
      %c0_28 = arith.constant 0 : index
      %c0_29 = arith.constant 0 : index
      %46 = vector.load %arg7[%c0_28, %c0_29] : memref<64x1xf32, #tpu.memory_space<vmem>>, vector<64x1xf32>
      %c0_30 = arith.constant 0 : index
      %c0_31 = arith.constant 0 : index
      %47 = vector.load %arg8[%c0_30, %c0_31] : memref<64x1xf32, #tpu.memory_space<vmem>>, vector<64x1xf32>
      %48 = math.log %47 : vector<64x1xf32>
      %49 = arith.addf %46, %48 : vector<64x1xf32>
      %50 = arith.subf %45, %49 : vector<64x1xf32>
      %c0_32 = arith.constant 0 : index
      %c0_33 = arith.constant 0 : index
      %51 = vector.load %arg6[%c0_32, %c0_33] : memref<64x1xf32, #tpu.memory_space<vmem>>, vector<64x1xf32>
      tpu.vector_store %arg6[%c0_32, %c0_33], %50 {strides = array<i32>} : memref<64x1xf32, #tpu.memory_space<vmem>>, vector<64x1xf32>,
    } else {
    }
    return
  }
  func.func @transform_0(%arg0: i32, %arg1: i32) -> (i32, i32) {
    %c0_i32 = arith.constant 0 : i32
    %c0_i32_0 = arith.constant 0 : i32
    return %arg0, %c0_i32 : i32, i32
  }
  func.func @transform_1(%arg0: i32, %arg1: i32) -> (i32, i32) {
    %c0_i32 = arith.constant 0 : i32
    %c0_i32_0 = arith.constant 0 : i32
    return %arg0, %c0_i32 : i32, i32
  }
  func.func @transform_2(%arg0: i32, %arg1: i32) -> (i32, i32) {
    %c0_i32 = arith.constant 0 : i32
    %c0_i32_0 = arith.constant 0 : i32
    return %c0_i32, %arg1 : i32, i32
  }
  func.func @transform_3(%arg0: i32, %arg1: i32) -> (i32, i32) {
    %c0_i32 = arith.constant 0 : i32
    return %arg0, %arg1 : i32, i32
  }
  func.func @transform_4(%arg0: i32, %arg1: i32) -> (i32, i32) {
    %c0_i32 = arith.constant 0 : i32
    %c0_i32_0 = arith.constant 0 : i32
    return %arg0, %c0_i32 : i32, i32
  }
}

</mosaic_0001>

<bundles_post_ra>
// kernel: squeeze.2
= control target key start
LH: loop header
LB: loop body
LE: loop exit
PB: predicated region body
PF: predicated region fallthrough
CT: control target
= control target key end

     0   :  { %vm7_vm0 = vcmask 490496   ;;  %s39_s0 = inlined_call_operand.vmem [shape: f32[120], index: 0, kind: input, shape index: {}]   ;;  %s40_s1 = inlined_call_operand.vmem [shape: f32[2,60], index: 1, kind: output, shape index: {}]  }
   0x1   :  { %v4_v0 = vld [vmem:[%s39_s0] sm:$0x1]  ;;  %s22_s0 = smov 68  }
   0x2   :  { %5 = vst [vmem:[#allocation1] sm:$0x1] %v4_v0 }
   0x9   :  { %v9_v1 = vld [vmem:[#allocation1] sm:$0x1]  }
   0xa   :  { %v6_v2 = vld [vmem:[#allocation1] sm:$0x1]   ;;  %10 = vrot.lane.b32.xlu0 %v9_v1, %s22_s0 }
   0xb   :  { %8 = vst.msk [vmem:[#allocation0] sm:$0x1] %vm7_vm0, %v6_v2  }
  0x7c   :  { %v11_v3 = vpop.permute.xlu0 %10  }
  0x7d   :  { %14 = vst.msk [vmem:[#allocation0 + $0x1] sm:$0x1] %vm7_vm0, %v11_v3  }
  0x84   :  { %v18_v4 = vld [vmem:[#allocation0] sm:$0x3] }
  0x85   :  { %20 = vst [vmem:[%s40_s1] sm:$0x3] %v18_v4 }

// kernel: forward.2
= control target key start
LH: loop header
LB: loop body
LE: loop exit
PB: predicated region body
PF: predicated region fallthrough
CT: control target
= control target key end

     0   :  { %s739_s15 = smov 0   ;;  %s808_s0 = inlined_call_operand.vmem [shape: bf16[128,128], index: 0, kind: input, shape index: {}]   ;;  %s809_s1 = inlined_call_operand.vmem [shape: bf16[128,128], index: 1, kind: input, shape index: {}]   ;;  %s810_s2 = inlined_call_operand.vmem [shape: bf16[1,128], index: 2, kind: input, shape index: {}]   ;;  %s811_s3 = inlined_call_operand.vmem [shape: bf16[128,128], index: 3, kind: output, shape index: {0}]   ;;  %s812_s4 = inlined_call_operand.vmem [shape: f32[128,1], index: 4, kind: output, shape index: {1}]  }
   0x1 LB: > { %s554_s16 = sadd.s32 4294967295, %s712_s15   ;;  %p558_p0 = scmp.ge.s32.totalorder %s712_s15, 1  ;;  %s712_s15 = sphi %s739_s15, %s15_s15  }
   0x2   : > { %p166_p1 = scmp.lt.s32.totalorder %s712_s15, 3 }
   0x4   : > { %p167_p2 = pnand %p558_p0, %p166_p1 }
   0x5   : > { %v678_v0 = vld [vmem:[%s809_s1] sm:$0xff] (!%p167_p2)   ;;  %s559_s19 = sshll.u32 (!%p167_p2), %s554_s16, 3  ;;  %v679_v1 = vld [vmem:[%s809_s1 + $0x8] sm:$0xff] (!%p167_p2)   ;;  %v680_v2 = vld [vmem:[%s809_s1 + $0x10] sm:$0xff] (!%p167_p2)   ;;  %v427_v12 = vlaneseq (!%p167_p2)  ;;  %vm455_vm0 = vcmask (!%p167_p2), 7168  }
   0x6   : > { %170 = sbr.rel (%p167_p2) target bundleno = 419 (0x1a3), region = 32  ;;  %p198_p3 = scmp.lt.s32.totalorder (!%p167_p2), %s559_s19, 15  ;;  %630 = vmatprep.subr.bf16.mxu0 (!%p167_p2), %v678_v0  ;;  %654 = vmatprep.subr.bf16.mxu1 (!%p167_p2), %v678_v0  ;;  %v681_v3 = vld [vmem:[%s809_s1 + $0x18] sm:$0xff] (!%p167_p2)   ;;  %v682_v6 = vld [vmem:[%s809_s1 + $0x20] sm:$0xff] (!%p167_p2)   ;;  %v683_v7 = vld [vmem:[%s809_s1 + $0x28] sm:$0xff] (!%p167_p2)  }
   0x7   : > { %631 = vmatpush3.bf16.msra.mxu0 (!%p167_p2), %v678_v0  ;;  %662 = vmatpush3.bf16.msra.mxu1 (!%p167_p2), %v678_v0  ;;  %v684_v8 = vld [vmem:[%s809_s1 + $0x30] sm:$0xff] (!%p167_p2)   ;;  %v685_v9 = vld [vmem:[%s809_s1 + $0x38] sm:$0xff] (!%p167_p2)   ;;  %v428_v15 = vshrl.u32 (!%p167_p2), %v427_v12, 7  ;;  %v425_v18 = vld [vmem:[%s810_s2] sm:$0x1] (!%p167_p2) }
   0x8   : > { %632 = vmatprep.subr.bf16.mxu0 (!%p167_p2), %v679_v1  ;;  %655 = vmatprep.subr.bf16.mxu1 (!%p167_p2), %v679_v1  ;;  %v426_v23 = vunpack.c.l.bf16 (!%p167_p2), %v425_v18 }
   0x9   : > { %v429_v24 = vsub.s32 (!%p167_p2), 0, %v428_v15 }
   0xb   : > { %633 = vmatpush3.bf16.msra.mxu0 (!%p167_p2), %v679_v1  ;;  %663 = vmatpush3.bf16.msra.mxu1 (!%p167_p2), %v679_v1  ;;  %v430_v25 = vrot.slane (!%p167_p2), %v426_v23, %v429_v24 }
   0xc   : > { %634 = vmatprep.subr.bf16.mxu0 (!%p167_p2), %v680_v2  ;;  %656 = vmatprep.subr.bf16.mxu1 (!%p167_p2), %v680_v2 }
   0xd   : > { %s814_s19 = smov (!%p198_p3, %s559_s19), 15 }
   0xe   : > { %s560_s24 = sshll.u32 %s814_s19, 2  ;;  %s564_s18 = sshll.u32 %s814_s19, 3 }
   0xf   : > { %s764_s27 = scalar_lea.vmem %s808_s0, %s560_s24  ;;  %635 = vmatpush3.bf16.msra.mxu0 %v680_v2  ;;  %664 = vmatpush3.bf16.msra.mxu1 %v680_v2  ;;  %s207_s17 = scalar_lea.vmem %s811_s3, %s560_s24 }
  0x10   : > { %v686_v4 = vld [vmem:[%s764_s27] sm:$0xff]   ;;  %v688_v5 = vld [vmem:[%s764_s27 + $0x10] sm:$0xff]   ;;  %636 = vmatprep.subr.bf16.mxu0 %v681_v3  ;;  %657 = vmatprep.subr.bf16.mxu1 %v681_v3  ;;  %v687_v10 = vld [vmem:[%s764_s27 + $0x8] sm:$0xff]   ;;  %s213_s22 = scalar_lea.vmem %s812_s4, %s564_s18 }
  0x11   : > { %646 = vmatprep.mubr.bf16.mxu0 %v686_v4  ;;  %650 = vmatprep.mubr.bf16.mxu1 %v688_v5  ;;  %v689_v11 = vld [vmem:[%s764_s27 + $0x18] sm:$0xff]  }
  0x13   : > { %637 = vmatpush3.bf16.msra.mxu0 %v681_v3  ;;  %665 = vmatpush3.bf16.msra.mxu1 %v681_v3 }
  0x14   : > { %638 = vmatprep.subr.bf16.mxu0 %v682_v6  ;;  %658 = vmatprep.subr.bf16.mxu1 %v682_v6 }
  0x17   : > { %639 = vmatpush3.bf16.msra.mxu0 %v682_v6  ;;  %666 = vmatpush3.bf16.msra.mxu1 %v682_v6 }
  0x18   : > { %640 = vmatprep.subr.bf16.mxu0 %v683_v7  ;;  %659 = vmatprep.subr.bf16.mxu1 %v683_v7 }
  0x1b   : > { %641 = vmatpush3.bf16.msra.mxu0 %v683_v7  ;;  %667 = vmatpush3.bf16.msra.mxu1 %v683_v7 }
  0x1c   : > { %642 = vmatprep.subr.bf16.mxu0 %v684_v8  ;;  %660 = vmatprep.subr.bf16.mxu1 %v684_v8 }
  0x1f   : > { %643 = vmatpush3.bf16.msra.mxu0 %v684_v8  ;;  %668 = vmatpush3.bf16.msra.mxu1 %v684_v8 }
  0x20   : > { %644 = vmatprep.subr.bf16.mxu0 %v685_v9  ;;  %661 = vmatprep.subr.bf16.mxu1 %v685_v9 }
  0x23   : > { %645 = vmatpush3.bf16.msra.mxu0 %v685_v9  ;;  %669 = vmatpush3.bf16.msra.mxu1 %v685_v9 }
  0x26   : > { %647 = vmatmul.mubr.bf16.vlgmr.msra.gmra.mrb[0].mxu0 %v687_v10  ;;  %651 = vmatmul.mubr.bf16.vlgmr.msra.gmra.mrb[0].mxu1 %v689_v11 }
  0xf9   : > { %v648_v13 = vpop.f32.mrb[0].mxu0  ;;  %v652_v14 = vpop.f32.mrb[0].mxu1 }
  0xfa   : > { %690 = vtanh.f32 %v648_v13  ;;  %v346_v16 = vpop.f32.mrb[1].mxu0  ;;  %v362_v17 = vpop.f32.mrb[1].mxu1 }
  0xfb   : > { %692 = vtanh.f32 %v346_v16  ;;  %v649_v19 = vpop.f32.mrb[2].mxu0  ;;  %v653_v20 = vpop.f32.mrb[2].mxu1 }
  0xfc   : > { %694 = vtanh.f32 %v652_v14  ;;  %v349_v21 = vpop.f32.mrb[3].mxu0  ;;  %v365_v22 = vpop.f32.mrb[3].mxu1 }
  0xfd   : > { %696 = vtanh.f32 %v649_v19 }
  0xfe   : > { %698 = vtanh.f32 %v362_v17 }
  0xff   : > { %700 = vtanh.f32 %v349_v21 }
 0x100   : > { %702 = vtanh.f32 %v653_v20 }
 0x101   : > { %704 = vtanh.f32 %v365_v22 }
 0x104   : > { %v691_v26 = vpop.eup %690 }
 0x105   : > { %v693_v27 = vpop.eup %692  ;;  %v433_v28 = vmul.f32 %v691_v26, %v430_v25 }
 0x106   : > { %v695_v29 = vpop.eup %694  ;;  %v431_v30 = vmul.f32 %v693_v27, %v430_v25 }
 0x107   : > { %v697_v31 = vpop.eup %696  ;;  %443 = vadd.xlane.f32.xlu1 %v433_v28  ;;  %v437_v45 = vmul.f32 %v695_v29, %v430_v25 }
 0x108   : > { %v699_v32 = vpop.eup %698  ;;  %v603_v33 = vpack.c.bf16 %v697_v31, %v691_v26  ;;  %439 = vadd.xlane.f32.xlu0 %v431_v30  ;;  %v434_v35 = vmul.f32 %v697_v31, %v430_v25 }
 0x109   : > { %v701_v34 = vpop.eup %700  ;;  %v435_v36 = vmul.f32 %v699_v32, %v430_v25 }
 0x10a   : > { %v703_v37 = vpop.eup %702  ;;  %615 = vst [vmem:[%s207_s17 + $0x8] sm:$0xff] %v603_v33   ;;  %v598_v38 = vpack.c.bf16 %v701_v34, %v693_v27  ;;  %v432_v43 = vmul.f32 %v701_v34, %v430_v25 }
 0x10b   : > { %v705_v39 = vpop.eup %704  ;;  %v613_v40 = vpack.c.bf16 %v703_v37, %v695_v29  ;;  %445 = vadd.xlane.f32.xlu1 %v434_v35  ;;  %v438_v44 = vmul.f32 %v703_v37, %v430_v25 }
 0x10c   : > { %599 = vst [vmem:[%s207_s17] sm:$0xff] %v598_v38   ;;  %v608_v41 = vpack.c.bf16 %v705_v39, %v699_v32  ;;  %447 = vadd.xlane.f32.xlu0 %v435_v36  ;;  %v436_v42 = vmul.f32 %v705_v39, %v430_v25 }
 0x10d   : > { %617 = vst [vmem:[%s207_s17 + $0x18] sm:$0xff] %v613_v40  }
 0x10e   : > { %616 = vst [vmem:[%s207_s17 + $0x10] sm:$0xff] %v608_v41  }
 0x10f   : > { %449 = vadd.xlane.f32.xlu1 %v436_v42 }
 0x110   : > { %441 = vadd.xlane.f32.xlu0 %v432_v43 }
 0x113   : > { %453 = vadd.xlane.f32.xlu1 %v438_v44 }
 0x114   : > { %451 = vadd.xlane.f32.xlu0 %v437_v45 }
 0x194   : > { %v444_v46 = vpop.xlane.xlu1 %443 }
 0x195   : > { %458 = vst.msk [vmem:[%s213_s22 + $0x10] sm:$0xff] %vm455_vm0, %v444_v46  ;;  %v440_v47 = vpop.xlane.xlu0 %439 }
 0x196   : > { %456 = vst.msk [vmem:[%s213_s22] sm:$0xff] %vm455_vm0, %v440_v47 }
 0x198   : > { %v446_v48 = vpop.xlane.xlu1 %445 }
 0x199   : > { %459 = vst.msk [vmem:[%s213_s22 + $0x18] sm:$0xff] %vm455_vm0, %v446_v48  ;;  %v448_v49 = vpop.xlane.xlu0 %447 }
 0x19a   : > { %460 = vst.msk [vmem:[%s213_s22 + $0x20] sm:$0xff] %vm455_vm0, %v448_v49 }
 0x19c   : > { %v450_v50 = vpop.xlane.xlu1 %449 }
 0x19d   : > { %461 = vst.msk [vmem:[%s213_s22 + $0x28] sm:$0xff] %vm455_vm0, %v450_v50  ;;  %v442_v51 = vpop.xlane.xlu0 %441 }
 0x19e   : > { %457 = vst.msk [vmem:[%s213_s22 + $0x8] sm:$0xff] %vm455_vm0, %v442_v51 }
 0x1a0   : > { %v454_v52 = vpop.xlane.xlu1 %453 }
 0x1a1   : > { %463 = vst.msk [vmem:[%s213_s22 + $0x38] sm:$0xff] %vm455_vm0, %v454_v52  ;;  %v452_v53 = vpop.xlane.xlu0 %451 }
 0x1a2   : > { %462 = vst.msk [vmem:[%s213_s22 + $0x30] sm:$0xff] %vm455_vm0, %v452_v53 }
 0x1a3 PF: > { %s15_s15 = sadd.s32 1, %s712_s15  }
 0x1a4   : > { %p12_p4 = scmp.ge.s32.totalorder %s15_s15, 4  }
 0x1a6   :  { %14 = sbr.rel (!%p12_p4) target bundleno = 1 (0x1), region = 74 }

// kernel: forward.3
= control target key start
LH: loop header
LB: loop body
LE: loop exit
PB: predicated region body
PF: predicated region fallthrough
CT: control target
= control target key end

     0   :  { %s2190_s0 = inlined_call_operand.vmem [shape: bf16[128,128], index: 0, kind: input, shape index: {}]   ;;  %s2191_s1 = inlined_call_operand.vmem [shape: s32[128,1], index: 1, kind: input, shape index: {}]   ;;  %s2192_s2 = inlined_call_operand.vmem [shape: bf16[128,512], index: 2, kind: input, shape index: {}]   ;;  %s2193_s3 = inlined_call_operand.vmem [shape: bf16[128,512], index: 3, kind: output, shape index: {0}]   ;;  %s2194_s4 = inlined_call_operand.vmem [shape: f32[128,1], index: 4, kind: output, shape index: {1}]  }
   0x1   :  { %2196 = sst [smem:[#allocation8_spill]] %s2192_s2 }
   0x2   :  { %s1622_s15 = smov 0   ;;  %s1624_s16 = smov 0  }
   0x3   :  { %s1626_s17 = smov 0   ;;  %s1628_s18 = smov 0  }
   0x4   :  { %s1630_s19 = smov 0   ;;  %s1632_s20 = smov 0  }
   0x5   :  { %s1634_s21 = smov 0   ;;  %s1636_s22 = smov 0  }
   0x6   :  { %s1638_s23 = smov 0  }
   0x7 LB: > { %s1273_s24 = sadd.s32 4294967295, %s1592_s23   ;;  %s24_s25 = sadd.s32 1, %s1584_s21  ;;  %s1592_s23 = sphi %s1638_s23, %s15_s23   ;;  %s1588_s22 = sphi %s1636_s22, %s2214_s22   ;;  %s1584_s21 = sphi %s1634_s21, %s2213_s21   ;;  %s1580_s20 = sphi %s1632_s20, %s2212_s20   ;;  %s1576_s19 = sphi %s1630_s19, %s2211_s19   ;;  %s1572_s18 = sphi %s1628_s18, %s2210_s18   ;;  %s1568_s17 = sphi %s1626_s17, %s2209_s17   ;;  %s1564_s16 = sphi %s1624_s16, %s2208_s16   ;;  %s1560_s15 = sphi %s1622_s15, %s2207_s15  }
   0x8   : > { %p25_p0 = scmp.ge.s32.totalorder %s24_s25, 2  ;;  %s27_s26 = sadd.s32 1, %s1588_s22 }
   0x9   : > { %s86_s27 = sadd.s32 1, %s1572_s18  ;;  %p93_p1 = scmp.ne.s32.totalorder %s1572_s18, %s1568_s17 }
   0xa   : > { %s2216_s25 = smov (%p25_p0, %s24_s25), 0  ;;  %s2218_s26 = smov (!%p25_p0, %s27_s26), %s1588_s22 }
   0xb   : > { %s83_s28 = ssub.s32 %s1584_s21, %s2216_s25  ;;  %p94_p2 = scmp.eq.s32.totalorder %s1592_s23, 0 }
   0xc   : > { %p29_p3 = scmp.ge.s32.totalorder %s2218_s26, 2  ;;  %p84_p4 = scmp.eq.s32.totalorder %s83_s28, 0 }
   0xd   : > { %p95_p5 = por %p94_p2, %p93_p1  ;;  %s114_s29 = sadd.s32 1, %s1564_s16 }
   0xe   : > { %s2220_s26 = smov (%p29_p3, %s2218_s26), 0  ;;  %p124_p6 = scmp.ne.s32.totalorder %s1564_s16, %s1560_s15 }
   0xf   : > { %2197 = sst [smem:[#allocation7_spill]] %s2220_s26  ;;  %s109_s5 = ssub.s32 %s1588_s22, %s2220_s26 }
  0x10   : > { %s1683_s30 = scalar_select %p84_p4, %s1572_s18, %s86_s27  }
  0x11   : > { %s111_s6 = sor.u32 %s109_s5, %s83_s28  ;;  %p125_p7 = scmp.eq.s32.totalorder %s1273_s24, 3 }
  0x12   : > { %p112_p8 = scmp.eq.s32.totalorder %s111_s6, 0  ;;  %p1276_p10 = scmp.ge.s32.totalorder %s1592_s23, 4 }
  0x13   : > { %p1689_p9 = por %p125_p7, %p124_p6 }
  0x14   : > { %s1694_s8 = scalar_select %p112_p8, %s1564_s16, %s114_s29  }
  0x15   : > { %173 = sbr.rel (%p1276_p10) target bundleno = 46 (0x2e), region = 16 }
  0x1c   : > { %194 = sbr.rel (!%p95_p5) target bundleno = 46 (0x2e), region = 28  ;;  %s196_s9 = sand.u32 (%p95_p5), 1, %s1572_s18  }
  0x1d   : > { %s1327_s10 = sshll.u32 (%p95_p5), %s1584_s21, 3  ;;  %s1277_s11 = sshll.u32 (%p95_p5), %s196_s9, 7 }
  0x1e   : > { %s2199_s2 = sld [smem:[#allocation8_spill]] (%p95_p5)  ;;  %s198_s24 = scalar_lea.vmem (%p95_p5), [#allocation5], %s1277_s11 }
  0x24   : > { %s1702_s14 = scalar_lea.vmem %s2199_s2, %s1327_s10 }
  0x25   : > { %v259_v0 = vld [vmem:[%s1702_s14] sm:$0xff]  ;;  %v261_v1 = vld [vmem:[%s1702_s14 + $0x10] sm:$0xff] }
  0x26   : > { %v263_v2 = vld [vmem:[%s1702_s14 + $0x20] sm:$0xff]  ;;  %260 = vst [vmem:[%s198_s24] sm:$0xff] %v259_v0  ;;  %262 = vst [vmem:[%s198_s24 + $0x8] sm:$0xff] %v261_v1  ;;  %v265_v3 = vld [vmem:[%s1702_s14 + $0x30] sm:$0xff] }
  0x27   : > { %264 = vst [vmem:[%s198_s24 + $0x10] sm:$0xff] %v263_v2  ;;  %v267_v4 = vld [vmem:[%s1702_s14 + $0x40] sm:$0xff]  ;;  %v269_v5 = vld [vmem:[%s1702_s14 + $0x50] sm:$0xff]  ;;  %266 = vst [vmem:[%s198_s24 + $0x18] sm:$0xff] %v265_v3 }
  0x28   : > { %268 = vst [vmem:[%s198_s24 + $0x20] sm:$0xff] %v267_v4  ;;  %270 = vst [vmem:[%s198_s24 + $0x28] sm:$0xff] %v269_v5  ;;  %v271_v6 = vld [vmem:[%s1702_s14 + $0x60] sm:$0xff]  ;;  %v273_v7 = vld [vmem:[%s1702_s14 + $0x70] sm:$0xff] }
  0x29   : > { %v275_v8 = vld [vmem:[%s1702_s14 + $0x80] sm:$0xff]  ;;  %272 = vst [vmem:[%s198_s24 + $0x30] sm:$0xff] %v271_v6  ;;  %274 = vst [vmem:[%s198_s24 + $0x38] sm:$0xff] %v273_v7  ;;  %v277_v9 = vld [vmem:[%s1702_s14 + $0x90] sm:$0xff] }
  0x2a   : > { %276 = vst [vmem:[%s198_s24 + $0x40] sm:$0xff] %v275_v8  ;;  %v279_v10 = vld [vmem:[%s1702_s14 + $0xa0] sm:$0xff]  ;;  %v281_v11 = vld [vmem:[%s1702_s14 + $0xb0] sm:$0xff]  ;;  %278 = vst [vmem:[%s198_s24 + $0x48] sm:$0xff] %v277_v9 }
  0x2b   : > { %280 = vst [vmem:[%s198_s24 + $0x50] sm:$0xff] %v279_v10  ;;  %282 = vst [vmem:[%s198_s24 + $0x58] sm:$0xff] %v281_v11  ;;  %v283_v12 = vld [vmem:[%s1702_s14 + $0xc0] sm:$0xff]  ;;  %v285_v13 = vld [vmem:[%s1702_s14 + $0xd0] sm:$0xff] }
  0x2c   : > { %v287_v14 = vld [vmem:[%s1702_s14 + $0xe0] sm:$0xff]  ;;  %284 = vst [vmem:[%s198_s24 + $0x60] sm:$0xff] %v283_v12  ;;  %286 = vst [vmem:[%s198_s24 + $0x68] sm:$0xff] %v285_v13  ;;  %v289_v15 = vld [vmem:[%s1702_s14 + $0xf0] sm:$0xff] }
  0x2d   : > { %288 = vst [vmem:[%s198_s24 + $0x70] sm:$0xff] %v287_v14  ;;  %290 = vst [vmem:[%s198_s24 + $0x78] sm:$0xff] %v289_v15 }
  0x2e PF: > { %p1280_p11 = scmp.ge.s32.totalorder %s1592_s23, 1  ;;  %p295_p12 = scmp.lt.s32.totalorder %s1592_s23, 5 }
  0x30   : > { %p296_p13 = pnand %p1280_p11, %p295_p12 }
  0x31   : > { %s302_s27 = sand.u32 (!%p296_p13), 1, %s1568_s17   ;;  %s331_s28 = sand.u32 (!%p296_p13), 1, %s1560_s15  }
  0x32   : > { %299 = sbr.rel (%p296_p13) target bundleno = 834 (0x342), region = 66  ;;  %s1281_s29 = sshll.u32 (!%p296_p13), %s302_s27, 7 }
  0x33   : > { %s1282_s5 = sshll.u32 (!%p296_p13), %s331_s28, 6  ;;  %s1283_s6 = sshll.u32 (!%p296_p13), %s1580_s20, 3 }
  0x34   : > { %p342_p0 = scmp.lt.s32.totalorder (!%p296_p13), %s1283_s6, 15  ;;  %s1740_s27 = scalar_lea.vmem (!%p296_p13), [#allocation5], %s1281_s29 }
  0x35   : > { %s1742_s28 = scalar_lea.vmem (!%p296_p13), [#allocation6], %s1282_s5  ;;  %p1289_p1 = scmp.ne.s32.totalorder (!%p296_p13), %s1576_s19, 0 }
  0x39   : > { %s2222_s6 = smov (!%p342_p0, %s1283_s6), 15  ;;  %366 = sbr.rel (%p1289_p1) target bundleno = 71 (0x47), region = 74 }
  0x3a   : > { %s1284_s9 = sshll.u32 %s2222_s6, 2  ;;  %s1286_s10 = sshll.u32 %s2222_s6, 3  ;;  %vm367_vm0 = vcmask (!%p1289_p1), 7168   ;;  %v1594_v16 = vmov (!%p1289_p1), -inf   ;;  %v1595_v17 = vmov (!%p1289_p1), 0.0  }
  0x3b   : > { %s1728_s13 = scalar_lea.vmem %s2190_s0, %s1284_s9  ;;  %s1733_s2 = scalar_lea.vmem %s2191_s1, %s1286_s10  ;;  %368 = vst.msk [vmem:[#allocation2] sm:$0xff] (!%p1289_p1), %vm367_vm0, %v1594_v16  ;;  %369 = vst.msk [vmem:[#allocation2 + $0x8] sm:$0xff] (!%p1289_p1), %vm367_vm0, %v1594_v16 }
  0x3c   : > { %s1738_s15 = scalar_lea.vmem %s2194_s4, %s1286_s10  ;;  %370 = vst.msk [vmem:[#allocation2 + $0x10] sm:$0xff] (!%p1289_p1), %vm367_vm0, %v1594_v16  ;;  %371 = vst.msk [vmem:[#allocation2 + $0x18] sm:$0xff] (!%p1289_p1), %vm367_vm0, %v1594_v16 }
  0x3d   : > { %372 = vst.msk [vmem:[#allocation2 + $0x20] sm:$0xff] (!%p1289_p1), %vm367_vm0, %v1594_v16  ;;  %373 = vst.msk [vmem:[#allocation2 + $0x28] sm:$0xff] (!%p1289_p1), %vm367_vm0, %v1594_v16 }
  0x3e   : > { %374 = vst.msk [vmem:[#allocation2 + $0x30] sm:$0xff] (!%p1289_p1), %vm367_vm0, %v1594_v16  ;;  %375 = vst.msk [vmem:[#allocation2 + $0x38] sm:$0xff] (!%p1289_p1), %vm367_vm0, %v1594_v16 }
  0x3f   : > { %376 = vst.msk [vmem:[#allocation3] sm:$0xff] (!%p1289_p1), %vm367_vm0, %v1595_v17  ;;  %377 = vst.msk [vmem:[#allocation3 + $0x8] sm:$0xff] (!%p1289_p1), %vm367_vm0, %v1595_v17 }
  0x40   : > { %378 = vst.msk [vmem:[#allocation3 + $0x10] sm:$0xff] %vm367_vm0, %v1595_v17  ;;  %379 = vst.msk [vmem:[#allocation3 + $0x18] sm:$0xff] %vm367_vm0, %v1595_v17 }
  0x41   : > { %380 = vst.msk [vmem:[#allocation3 + $0x20] sm:$0xff] %vm367_vm0, %v1595_v17  ;;  %381 = vst.msk [vmem:[#allocation3 + $0x28] sm:$0xff] %vm367_vm0, %v1595_v17 }
  0x42   : > { %382 = vst.msk [vmem:[#allocation3 + $0x30] sm:$0xff] %vm367_vm0, %v1595_v17  ;;  %383 = vst.msk [vmem:[#allocation3 + $0x38] sm:$0xff] %vm367_vm0, %v1595_v17 }
  0x43   : > { %384 = vst.msk [vmem:[#allocation4] sm:$0xff] %vm367_vm0, %v1595_v17  ;;  %385 = vst.msk [vmem:[#allocation4 + $0x8] sm:$0xff] %vm367_vm0, %v1595_v17 }
  0x44   : > { %386 = vst.msk [vmem:[#allocation4 + $0x10] sm:$0xff] %vm367_vm0, %v1595_v17  ;;  %387 = vst.msk [vmem:[#allocation4 + $0x18] sm:$0xff] %vm367_vm0, %v1595_v17 }
  0x45   : > { %388 = vst.msk [vmem:[#allocation4 + $0x20] sm:$0xff] %vm367_vm0, %v1595_v17  ;;  %389 = vst.msk [vmem:[#allocation4 + $0x28] sm:$0xff] %vm367_vm0, %v1595_v17 }
  0x46   : > { %390 = vst.msk [vmem:[#allocation4 + $0x30] sm:$0xff] %vm367_vm0, %v1595_v17  ;;  %391 = vst.msk [vmem:[#allocation4 + $0x38] sm:$0xff] %vm367_vm0, %v1595_v17 }
  0x47 PF: > { %v1430_v18 = vld [vmem:[%s1740_s27 + $0x4] ss:$8 sps:$4 sm:$0xff]   ;;  %v1432_v19 = vld [vmem:[%s1740_s27] ss:$8 sps:$4 sm:$0xff]   ;;  %v1596_v20 = vmov 0   ;;  %v1455_v36 = vld [vmem:[%s1728_s13 + $0x10] sm:$0xff]   ;;  %v649_v39 = vlaneseq }
  0x48   : > { %552 = vmatprep.mubr.bf16.mxu0 %v1596_v20  ;;  %572 = vmatprep.mubr.bf16.mxu1 %v1596_v20  ;;  %v1433_v21 = vld [vmem:[%s1740_s27 + $0x14] ss:$8 sps:$4 sm:$0xff]   ;;  %v1435_v22 = vld [vmem:[%s1740_s27 + $0x10] ss:$8 sps:$4 sm:$0xff]   ;;  %v1436_v23 = vld [vmem:[%s1740_s27 + $0x24] ss:$8 sps:$4 sm:$0xff]  }
  0x49   : > { %520 = vmatprep.subr.bf16.mxu0 %v1430_v18  ;;  %1337 = vmatprep.subr.bf16.mxu1 %v1430_v18  ;;  %v1438_v24 = vld [vmem:[%s1740_s27 + $0x20] ss:$8 sps:$4 sm:$0xff]   ;;  %v1439_v25 = vld [vmem:[%s1740_s27 + $0x34] ss:$8 sps:$4 sm:$0xff]   ;;  %v1441_v26 = vld [vmem:[%s1740_s27 + $0x30] ss:$8 sps:$4 sm:$0xff]  }
  0x4a   : > { %521 = vmatpush1.bf16.msra.mxu0 %v1432_v19  ;;  %1345 = vmatpush1.bf16.msra.mxu1 %v1432_v19  ;;  %v1442_v27 = vld [vmem:[%s1740_s27 + $0x44] ss:$8 sps:$4 sm:$0xff]   ;;  %v1444_v28 = vld [vmem:[%s1740_s27 + $0x40] ss:$8 sps:$4 sm:$0xff]   ;;  %v1445_v29 = vld [vmem:[%s1740_s27 + $0x54] ss:$8 sps:$4 sm:$0xff]  }
  0x4b   : > { %522 = vmatprep.subr.bf16.mxu0 %v1433_v21  ;;  %1338 = vmatprep.subr.bf16.mxu1 %v1433_v21  ;;  %v1447_v30 = vld [vmem:[%s1740_s27 + $0x50] ss:$8 sps:$4 sm:$0xff]   ;;  %v1448_v31 = vld [vmem:[%s1740_s27 + $0x64] ss:$8 sps:$4 sm:$0xff]   ;;  %v1450_v32 = vld [vmem:[%s1740_s27 + $0x60] ss:$8 sps:$4 sm:$0xff]  }
  0x4c   : > { %1428 = vset.pattern.permute.xlu0 %v1596_v20  ;;  %1429 = vset.pattern.permute.xlu1 %v1596_v20  ;;  %v1451_v33 = vld [vmem:[%s1740_s27 + $0x74] ss:$8 sps:$4 sm:$0xff]   ;;  %v1453_v34 = vld [vmem:[%s1740_s27 + $0x70] ss:$8 sps:$4 sm:$0xff]   ;;  %v1454_v35 = vld [vmem:[%s1728_s13] sm:$0xff]   ;;  %v650_v40 = vand.u32 127, %v649_v39 }
  0x4d   : > { %v1456_v37 = vld [vmem:[%s1728_s13 + $0x8] sm:$0xff]   ;;  %v1457_v38 = vld [vmem:[%s1728_s13 + $0x18] sm:$0xff]   ;;  %s1318_s26 = sshll.u32 %s1576_s19, 8  ;;  %vm874_vm3 = vcmask 7168   ;;  %p1319_p2 = scmp.ne.s32.totalorder %s1576_s19, 1 }
  0x4e   : > { %523 = vmatpush1.bf16.msra.mxu0 %v1435_v22  ;;  %1346 = vmatpush1.bf16.msra.mxu1 %v1435_v22  ;;  %v651_v41 = vadd.s32 128, %v650_v40  ;;  %v653_v42 = vstv %s1318_s26 }
  0x4f   : > { %524 = vmatprep.subr.bf16.mxu0 %v1436_v23  ;;  %1339 = vmatprep.subr.bf16.mxu1 %v1436_v23  ;;  %v1790_v43 = vadd.s32 %v653_v42, %v650_v40 }
  0x50   : > { %v1792_v44 = vadd.s32 %v653_v42, %v651_v41  ;;  %v1973_v41 = vld [vmem:[#allocation2 + $0x8] sm:$0xff]  ;;  %v1975_v42 = vld [vmem:[#allocation2 + $0x10] sm:$0xff] }
  0x51   : > { %vm656_vm1 = vcmp.lt.s32.totalorder %v1790_v43, 500 }
  0x52   : > { %525 = vmatpush1.bf16.msra.mxu0 %v1438_v24  ;;  %1347 = vmatpush1.bf16.msra.mxu1 %v1438_v24  ;;  %vm657_vm2 = vcmp.lt.s32.totalorder %v1792_v44, 500 }
  0x53   : > { %526 = vmatprep.subr.bf16.mxu0 %v1439_v25  ;;  %1340 = vmatprep.subr.bf16.mxu1 %v1439_v25 }
  0x56   : > { %527 = vmatpush1.bf16.msra.mxu0 %v1441_v26  ;;  %1348 = vmatpush1.bf16.msra.mxu1 %v1441_v26 }
  0x57   : > { %528 = vmatprep.subr.bf16.mxu0 %v1442_v27  ;;  %1341 = vmatprep.subr.bf16.mxu1 %v1442_v27 }
  0x5a   : > { %529 = vmatpush1.bf16.msra.mxu0 %v1444_v28  ;;  %1349 = vmatpush1.bf16.msra.mxu1 %v1444_v28 }
  0x5b   : > { %530 = vmatprep.subr.bf16.mxu0 %v1445_v29  ;;  %1342 = vmatprep.subr.bf16.mxu1 %v1445_v29  ;;  %v1948_v29 = vld [vmem:[#allocation2] sm:$0xff] }
  0x5e   : > { %531 = vmatpush1.bf16.msra.mxu0 %v1447_v30  ;;  %1350 = vmatpush1.bf16.msra.mxu1 %v1447_v30 }
  0x5f   : > { %532 = vmatprep.subr.bf16.mxu0 %v1448_v31  ;;  %1343 = vmatprep.subr.bf16.mxu1 %v1448_v31  ;;  %v1950_v31 = vld [vmem:[#allocation2 + $0x28] sm:$0xff] }
  0x62   : > { %533 = vmatpush1.bf16.msra.mxu0 %v1450_v32  ;;  %1351 = vmatpush1.bf16.msra.mxu1 %v1450_v32 }
  0x63   : > { %534 = vmatprep.subr.bf16.mxu0 %v1451_v33  ;;  %1344 = vmatprep.subr.bf16.mxu1 %v1451_v33 }
  0x66   : > { %535 = vmatpush1.bf16.msra.mxu0 %v1453_v34  ;;  %1352 = vmatpush1.bf16.msra.mxu1 %v1453_v34  ;;  %v1955_v34 = vld [vmem:[#allocation2 + $0x20] sm:$0xff] }
  0x69   : > { %553 = vmatmul.mubr.bf16.vlgmr.msra.gmra.mrb[0].mxu0 %v1454_v35  ;;  %573 = vmatmul.mubr.bf16.vlgmr.msra.gmra.mrb[0].mxu1 %v1455_v36 }
  0x6a   : > { %562 = vmatprep.mubr.bf16.mxu0 %v1596_v20  ;;  %582 = vmatprep.mubr.bf16.mxu1 %v1596_v20 }
  0x71   : > { %563 = vmatmul.mubr.bf16.gmra.mrb[4].mxu0 %v1456_v37  ;;  %583 = vmatmul.mubr.bf16.gmra.mrb[4].mxu1 %v1457_v38  ;;  %v900_v38 = vld [vmem:[%s1733_s2 + $0x8] sm:$0xff] }
 0x13c   : > { %v1796_v45 = vpop.f32.mrb[0].mxu0  ;;  %v1798_v46 = vpop.f32.mrb[0].mxu1 }
 0x13d   : > { %v1800_v47 = vpop.f32.mrb[1].mxu0  ;;  %v1802_v48 = vpop.f32.mrb[1].mxu1  ;;  %v1807_v49 = vsel %vm656_vm1, %v1796_v45, -inf  ;;  %v1812_v50 = vsel %vm656_vm1, %v1798_v46, -inf }
 0x13e   : > { %v1328_v51 = vpack.c.bf16 %v1800_v47, %v1796_v45  ;;  %v1816_v52 = vpop.f32.mrb[2].mxu0  ;;  %v1332_v53 = vpack.c.bf16 %v1802_v48, %v1798_v46  ;;  %v1820_v54 = vpop.f32.mrb[2].mxu1  ;;  %v1825_v55 = vsel %vm657_vm2, %v1800_v47, -inf  ;;  %v1830_v56 = vsel %vm657_vm2, %v1802_v48, -inf }
 0x13f   : > { %v1832_v57 = vpop.f32.mrb[3].mxu0  ;;  %v1834_v58 = vpop.f32.mrb[3].mxu1  ;;  %v682_v59 = vmax.f32 %v1807_v49, %v1825_v55  ;;  %v1841_v60 = vsel %vm656_vm1, %v1820_v54, -inf  ;;  %v694_v1 = vmax.f32 %v1812_v50, %v1830_v56  ;;  %v1865_v3 = vsel %vm656_vm1, %v1816_v52, -inf }
 0x140   : > { %641 = vst [vmem:[%s1742_s28] sm:$0xff] %v1328_v51  ;;  %645 = vst [vmem:[%s1742_s28 + $0x20] sm:$0xff] %v1332_v53  ;;  %v1329_v61 = vpack.c.bf16 %v1832_v57, %v1816_v52  ;;  %v1333_v62 = vpack.c.bf16 %v1834_v58, %v1820_v54  ;;  %v1852_v63 = vsel %vm657_vm2, %v1834_v58, -inf  ;;  %v1870_v4 = vsel %vm657_vm2, %v1832_v57, -inf }
 0x141   : > { %683 = vmax.xlane.f32.xlu0 %v682_v59  ;;  %v697_v0 = vmax.f32 %v1841_v60, %v1852_v63  ;;  %v685_v16 = vmax.f32 %v1865_v3, %v1870_v4  ;;  %v902_v59 = vld [vmem:[%s1733_s2 + $0x18] sm:$0xff] }
 0x142   : > { %642 = vst [vmem:[%s1742_s28 + $0x8] sm:$0xff] %v1329_v61  ;;  %646 = vst [vmem:[%s1742_s28 + $0x28] sm:$0xff] %v1333_v62 }
 0x143   : > { %698 = vmax.xlane.f32.xlu1 %v697_v0 }
 0x144   : > { %v1860_v2 = vpop.f32.mrb[4].mxu0  ;;  %v1872_v5 = vpop.f32.mrb[4].mxu1 }
 0x145   : > { %695 = vmax.xlane.f32.xlu0 %v694_v1  ;;  %v1874_v6 = vpop.f32.mrb[5].mxu0  ;;  %v1879_v7 = vsel %vm656_vm1, %v1860_v2, -inf  ;;  %v1881_v8 = vpop.f32.mrb[5].mxu1  ;;  %v1886_v9 = vsel %vm656_vm1, %v1872_v5, -inf  ;;  %v1989_v1 = vld [vmem:[#allocation2 + $0x18] sm:$0xff] }
 0x146   : > { %v1330_v10 = vpack.c.bf16 %v1874_v6, %v1860_v2  ;;  %v1890_v11 = vpop.f32.mrb[6].mxu0  ;;  %v1895_v12 = vsel %vm657_vm2, %v1874_v6, -inf  ;;  %v1334_v13 = vpack.c.bf16 %v1881_v8, %v1872_v5  ;;  %v1899_v14 = vpop.f32.mrb[6].mxu1  ;;  %v1904_v15 = vsel %vm657_vm2, %v1881_v8, -inf }
 0x147   : > { %v688_v17 = vmax.f32 %v1879_v7, %v1895_v12  ;;  %v1910_v18 = vpop.f32.mrb[7].mxu0  ;;  %v1912_v19 = vpop.f32.mrb[7].mxu1  ;;  %v1917_v20 = vsel %vm656_vm1, %v1890_v11, -inf  ;;  %v700_v25 = vmax.f32 %v1886_v9, %v1904_v15  ;;  %v1944_v27 = vsel %vm656_vm1, %v1899_v14, -inf }
 0x148   : > { %643 = vst [vmem:[%s1742_s28 + $0x10] sm:$0xff] %v1330_v10  ;;  %v1331_v21 = vpack.c.bf16 %v1910_v18, %v1890_v11  ;;  %v1925_v22 = vsel %vm657_vm2, %v1910_v18, -inf  ;;  %647 = vst [vmem:[%s1742_s28 + $0x30] sm:$0xff] %v1334_v13  ;;  %v1335_v23 = vpack.c.bf16 %v1912_v19, %v1899_v14  ;;  %v1939_v26 = vsel %vm657_vm2, %v1912_v19, -inf  ;;  %v1991_v10 = vld [vmem:[#allocation2 + $0x30] sm:$0xff] }
 0x149   : > { %686 = vmax.xlane.f32.xlu0 %v685_v16  ;;  %689 = vmax.xlane.f32.xlu1 %v688_v17  ;;  %v691_v24 = vmax.f32 %v1917_v20, %v1925_v22  ;;  %v703_v28 = vmax.f32 %v1944_v27, %v1939_v26  ;;  %v904_v17 = vld [vmem:[%s1733_s2 + $0x28] sm:$0xff] }
 0x14a   : > { %644 = vst [vmem:[%s1742_s28 + $0x18] sm:$0xff] %v1331_v21  ;;  %648 = vst [vmem:[%s1742_s28 + $0x38] sm:$0xff] %v1335_v23 }
 0x14d   : > { %692 = vmax.xlane.f32.xlu1 %v691_v24  ;;  %701 = vmax.xlane.f32.xlu0 %v700_v25 }
 0x151   : > { %704 = vmax.xlane.f32.xlu1 %v703_v28  ;;  %v2009_v28 = vld [vmem:[#allocation2 + $0x38] sm:$0xff] }
 0x1ce   : > { %v684_v30 = vpop.xlane.xlu0 %683 }
 0x1cf   : > { %v1953_v32 = vmax.f32 %v1948_v29, %v684_v30 }
 0x1d0   : > { %v699_v33 = vpop.xlane.xlu1 %698 }
 0x1d1   : > { %v714_v35 = vsub.f32 %v1948_v29, %v1953_v32  ;;  %883 = vst.msk [vmem:[#allocation2] sm:$0xff] %vm874_vm3, %v1953_v32  ;;  %v1962_v36 = vmax.f32 %v1950_v31, %v699_v33  ;;  %756 = vperm.xlu0 %1428, %v1953_v32   ;;  %v738_v32 = vld [vmem:[#allocation3] sm:$0xff] }
 0x1d2   : > { %v696_v37 = vpop.xlane.xlu0 %695 }
 0x1d3   : > { %v719_v39 = vsub.f32 %v1950_v31, %v1962_v36  ;;  %888 = vst.msk [vmem:[#allocation2 + $0x28] sm:$0xff] %vm874_vm3, %v1962_v36  ;;  %v1971_v40 = vmax.f32 %v1955_v34, %v696_v37  ;;  %v906_v37 = vld [vmem:[%s1733_s2 + $0x38] sm:$0xff] }
 0x1d5   : > { %887 = vst.msk [vmem:[#allocation2 + $0x20] sm:$0xff] %vm874_vm3, %v1971_v40  ;;  %911 = vperm.xlu0 %1428, %v900_v38   ;;  %776 = vperm.xlu1 %1429, %v1971_v40  }
 0x1d6   : > { %v687_v53 = vpop.xlane.xlu0 %686  ;;  %v690_v61 = vpop.xlane.xlu1 %689 }
 0x1d7   : > { %v1984_v62 = vmax.f32 %v1973_v41, %v687_v53  ;;  %v1987_v0 = vmax.f32 %v1975_v42, %v690_v61  ;;  %v899_v61 = vld [vmem:[%s1733_s2] sm:$0xff] }
 0x1d9   : > { %884 = vst.msk [vmem:[#allocation2 + $0x8] sm:$0xff] %vm874_vm3, %v1984_v62  ;;  %917 = vperm.xlu0 %1428, %v902_v59   ;;  %885 = vst.msk [vmem:[#allocation2 + $0x10] sm:$0xff] %vm874_vm3, %v1987_v0  ;;  %761 = vperm.xlu1 %1429, %v1984_v62  }
 0x1da   : > { %v693_v21 = vpop.xlane.xlu1 %692  ;;  %v702_v23 = vpop.xlane.xlu0 %701 }
 0x1db   : > { %v2004_v24 = vmax.f32 %v1989_v1, %v693_v21  ;;  %v2007_v25 = vmax.f32 %v1991_v10, %v702_v23  ;;  %v903_v21 = vld [vmem:[%s1733_s2 + $0x20] sm:$0xff]  ;;  %v905_v23 = vld [vmem:[%s1733_s2 + $0x30] sm:$0xff] }
 0x1dd   : > { %923 = vperm.xlu0 %1428, %v904_v17   ;;  %781 = vperm.xlu1 %1429, %v1962_v36   ;;  %886 = vst.msk [vmem:[#allocation2 + $0x18] sm:$0xff] %vm874_vm3, %v2004_v24  ;;  %889 = vst.msk [vmem:[#allocation2 + $0x30] sm:$0xff] %vm874_vm3, %v2007_v25  ;;  %v901_v17 = vld [vmem:[%s1733_s2 + $0x10] sm:$0xff]  ;;  %v2200_v31 = vsub.f32 %v1989_v1, %v2004_v24  ;;  %v2203_v1 = vsub.f32 %v1973_v41, %v1984_v62 }
 0x1de   : > { %v705_v38 = vpop.xlane.xlu1 %704  ;;  %v2205_v41 = vsub.f32 %v1991_v10, %v2007_v25 }
 0x1df   : > { %v2022_v53 = vmax.f32 %v2009_v28, %v705_v38  ;;  %v728_v36 = vmul.f32 1.442695, %v2200_v31 }
 0x1e0   : > { %v734_v62 = vmul.f32 1.442695, %v2205_v41 }
 0x1e1   : > { %929 = vperm.xlu0 %1428, %v906_v37   ;;  %766 = vperm.xlu1 %1429, %v1987_v0   ;;  %890 = vst.msk [vmem:[#allocation2 + $0x38] sm:$0xff] %vm874_vm3, %v2022_v53 }
 0x1e5   : > { %786 = vperm.xlu1 %1429, %v2007_v25  }
 0x1e9   : > { %771 = vperm.xlu1 %1429, %v2004_v24   ;;  %v724_v24 = vmul.f32 1.442695, %v2203_v1 }
 0x1ed   : > { %791 = vperm.xlu1 %1429, %v2022_v53  }
 0x1f1   : > { %908 = vperm.xlu1 %1429, %v899_v61  }
 0x1f5   : > { %914 = vperm.xlu1 %1429, %v901_v17  }
 0x1f9   : > { %920 = vperm.xlu1 %1429, %v903_v21  }
 0x1fd   : > { %926 = vperm.xlu1 %1429, %v905_v23  }
 0x250   : > { %v757_v37 = vpop.permute.xlu0 %756 }
 0x251   : > { %v794_v38 = vsub.f32 %v1807_v49, %v757_v37  ;;  %v795_v33 = vsub.f32 %v1825_v55, %v757_v37 }
 0x253   : > { %v810_v16 = vmul.f32 1.442695, %v794_v38  ;;  %v812_v13 = vmul.f32 1.442695, %v795_v33 }
 0x254   : > { %v912_v51 = vpop.permute.xlu0 %911  ;;  %v777_v59 = vpop.permute.xlu1 %776 }
 0x255   : > { %1458 = vpow2.f32 %v810_v16  ;;  %vm933_vm4 = vcmp.eq.s32.totalorder %v1790_v43, %v912_v51  ;;  %vm934_vm5 = vcmp.eq.s32.totalorder %v1792_v44, %v912_v51 }
 0x256   : > { %1460 = vpow2.f32 %v812_v13  ;;  %v949_v61 = vsel %vm933_vm4, %v1816_v52, 0.0  ;;  %v950_v17 = vsel %vm934_vm5, %v1832_v57, 0.0 }
 0x257   : > { %v966_v21 = vadd.f32 %v950_v17, %v949_v61 }
 0x258   : > { %v918_v23 = vpop.permute.xlu0 %917  ;;  %v762_v30 = vpop.permute.xlu1 %761 }
 0x259   : > { %vm937_vm6 = vcmp.eq.s32.totalorder %v1790_v43, %v918_v23  ;;  %vm938_vm7 = vcmp.eq.s32.totalorder %v1792_v44, %v918_v23  ;;  %967 = vadd.xlane.f32.xlu1 %v966_v21 }
 0x25a   : > { %v953_v49 = vsel %vm937_vm6, %v1890_v11, 0.0  ;;  %v954_v55 = vsel %vm938_vm7, %v1910_v18, 0.0 }
 0x25b   : > { %v972_v16 = vadd.f32 %v954_v55, %v953_v49  ;;  %v802_v55 = vsub.f32 %v1812_v50, %v777_v59 }
 0x25c   : > { %v924_v33 = vpop.permute.xlu0 %923  ;;  %v782_v51 = vpop.permute.xlu1 %781 }
 0x25d   : > { %vm941_vm8 = vcmp.eq.s32.totalorder %v1790_v43, %v924_v33  ;;  %vm942_vm9 = vcmp.eq.s32.totalorder %v1792_v44, %v924_v33  ;;  %v804_v52 = vsub.f32 %v1841_v60, %v782_v51  ;;  %973 = vadd.xlane.f32.xlu1 %v972_v16  ;;  %v805_v57 = vsub.f32 %v1852_v63, %v782_v51 }
 0x25e   : > { %v957_v13 = vsel %vm941_vm8, %v1820_v54, 0.0  ;;  %v958_v37 = vsel %vm942_vm9, %v1834_v58, 0.0  ;;  %v803_v16 = vsub.f32 %v1830_v56, %v777_v59 }
 0x25f   : > { %v1459_v38 = vpop.eup %1458  ;;  %v830_v11 = vmul.f32 1.442695, %v804_v52  ;;  %v978_v61 = vadd.f32 %v958_v37, %v957_v13  ;;  %v832_v17 = vmul.f32 1.442695, %v805_v57  ;;  %v826_v13 = vmul.f32 1.442695, %v802_v55 }
 0x260   : > { %v1461_v18 = vpop.eup %1460  ;;  %v930_v21 = vpop.permute.xlu0 %929 }
 0x261   : > { %v767_v23 = vpop.permute.xlu1 %766  ;;  %1462 = vpow2.f32 %v830_v11  ;;  %vm945_vm10 = vcmp.eq.s32.totalorder %v1790_v43, %v930_v21  ;;  %vm946_vm11 = vcmp.eq.s32.totalorder %v1792_v44, %v930_v21  ;;  %979 = vadd.xlane.f32.xlu1 %v978_v61  ;;  %v842_v63 = vadd.f32 %v1461_v18, %v1459_v38 }
 0x262   : > { %1464 = vpow2.f32 %v832_v17  ;;  %v961_v60 = vsel %vm945_vm10, %v1899_v14, 0.0  ;;  %v962_v54 = vsel %vm946_vm11, %v1912_v19, 0.0  ;;  %v828_v19 = vmul.f32 1.442695, %v803_v16 }
 0x263   : > { %v2058_v49 = vadd.f32 %v962_v54, %v961_v60  ;;  %v796_v11 = vsub.f32 %v1865_v3, %v762_v30  ;;  %v797_v61 = vsub.f32 %v1870_v4, %v762_v30  ;;  %v798_v21 = vsub.f32 %v1879_v7, %v767_v23 }
 0x264   : > { %v799_v4 = vsub.f32 %v1895_v12, %v767_v23 }
 0x265   : > { %v2056_v58 = vpop.permute.xlu1 %786  ;;  %843 = vadd.xlane.f32.xlu1 %v842_v63  ;;  %v814_v17 = vmul.f32 1.442695, %v796_v11  ;;  %v816_v3 = vmul.f32 1.442695, %v797_v61  ;;  %v818_v63 = vmul.f32 1.442695, %v798_v21 }
 0x266   : > { %v806_v7 = vsub.f32 %v1886_v9, %v2056_v58  ;;  %v820_v55 = vmul.f32 1.442695, %v799_v4  ;;  %v807_v12 = vsub.f32 %v1904_v15, %v2056_v58 }
 0x268   : > { %v834_v9 = vmul.f32 1.442695, %v806_v7  ;;  %v836_v15 = vmul.f32 1.442695, %v807_v12  ;;  %v2201_v12 = vsub.f32 %v2009_v28, %v2022_v53  ;;  %v2204_v53 = vsub.f32 %v1975_v42, %v1987_v0 }
 0x269   : > { %v772_v33 = vpop.permute.xlu1 %771 }
 0x26a   : > { %v800_v51 = vsub.f32 %v1917_v20, %v772_v33  ;;  %v801_v52 = vsub.f32 %v1925_v22, %v772_v33 }
 0x26b   : > { %v1463_v57 = vpop.eup %1462 }
 0x26c   : > { %v822_v14 = vmul.f32 1.442695, %v800_v51  ;;  %v824_v37 = vmul.f32 1.442695, %v801_v52  ;;  %v1465_v38 = vpop.eup %1464 }
 0x26d   : > { %v792_v18 = vpop.permute.xlu1 %791  ;;  %v857_v59 = vadd.f32 %v1465_v38, %v1463_v57 }
 0x26e   : > { %1466 = vpow2.f32 %v822_v14  ;;  %v808_v50 = vsub.f32 %v1944_v27, %v792_v18  ;;  %v809_v56 = vsub.f32 %v1939_v26, %v792_v18 }
 0x26f   : > { %1468 = vpow2.f32 %v824_v37  ;;  %858 = vadd.xlane.f32.xlu1 %v857_v59 }
 0x270   : > { %1470 = vpow2.f32 %v826_v13  ;;  %v838_v20 = vmul.f32 1.442695, %v808_v50  ;;  %v840_v22 = vmul.f32 1.442695, %v809_v56 }
 0x271   : > { %1472 = vpow2.f32 %v828_v19  ;;  %v909_v60 = vpop.permute.xlu1 %908 }
 0x272   : > { %1474 = vpow2.f32 %v838_v20  ;;  %vm931_vm12 = vcmp.eq.s32.totalorder %v1790_v43, %v909_v60  ;;  %vm932_vm13 = vcmp.eq.s32.totalorder %v1792_v44, %v909_v60 }
 0x273   : > { %1476 = vpow2.f32 %v840_v22  ;;  %v947_v26 = vsel %vm931_vm12, %v1796_v45, 0.0  ;;  %v948_v27 = vsel %vm932_vm13, %v1800_v47, 0.0 }
 0x274   : > { %v963_v30 = vadd.f32 %v948_v27, %v947_v26  ;;  %1478 = vpow2.f32 %v814_v17  ;;  %v896_v27 = vld [vmem:[#allocation4 + $0x28] sm:$0xff] }
 0x275   : > { %v915_v54 = vpop.permute.xlu1 %914  ;;  %1480 = vpow2.f32 %v816_v3  ;;  %v894_v3 = vld [vmem:[#allocation4 + $0x18] sm:$0xff] }
 0x276   : > { %vm935_vm14 = vcmp.eq.s32.totalorder %v1790_v43, %v915_v54  ;;  %vm936_vm15 = vcmp.eq.s32.totalorder %v1792_v44, %v915_v54  ;;  %964 = vadd.xlane.f32.xlu0 %v963_v30  ;;  %1482 = vpow2.f32 %v818_v63 }
 0x277   : > { %v951_v45 = vsel %vm935_vm14, %v1860_v2, 0.0  ;;  %v952_v47 = vsel %vm936_vm15, %v1874_v6, 0.0  ;;  %1484 = vpow2.f32 %v820_v55  ;;  %v743_v55 = vld [vmem:[#allocation3 + $0x28] sm:$0xff] }
 0x278   : > { %v1467_v23 = vpop.eup %1466  ;;  %v969_v16 = vadd.f32 %v952_v47, %v951_v45  ;;  %1486 = vpow2.f32 %v834_v9  ;;  %v736_v45 = vmul.f32 1.442695, %v2201_v12 }
 0x279   : > { %v1469_v33 = vpop.eup %1468  ;;  %v921_v51 = vpop.permute.xlu1 %920  ;;  %1488 = vpow2.f32 %v836_v15 }
 0x27a   : > { %v1471_v52 = vpop.eup %1470  ;;  %vm939_vm0 = vcmp.eq.s32.totalorder %v1790_v43, %v921_v51  ;;  %vm940_vm1 = vcmp.eq.s32.totalorder %v1792_v44, %v921_v51  ;;  %970 = vadd.xlane.f32.xlu0 %v969_v16  ;;  %v851_v57 = vadd.f32 %v1469_v33, %v1467_v23  ;;  %v2202_v23 = vsub.f32 %v1955_v34, %v1971_v40  ;;  %v893_v40 = vld [vmem:[#allocation4 + $0x10] sm:$0xff] }
 0x27b   : > { %v1473_v13 = vpop.eup %1472  ;;  %v955_v2 = vsel %vm939_vm0, %v1798_v46, 0.0  ;;  %v956_v6 = vsel %vm940_vm1, %v1802_v48, 0.0  ;;  %v726_v34 = vmul.f32 1.442695, %v2204_v53 }
 0x27c   : > { %v1475_v58 = vpop.eup %1474  ;;  %852 = vadd.xlane.f32.xlu1 %v851_v57  ;;  %v975_v14 = vadd.f32 %v956_v6, %v955_v2  ;;  %v854_v48 = vadd.f32 %v1473_v13, %v1471_v52  ;;  %v730_v16 = vmul.f32 1.442695, %v2202_v23  ;;  %v891_v52 = vld [vmem:[#allocation4] sm:$0xff]  ;;  %v741_v13 = vld [vmem:[#allocation3 + $0x18] sm:$0xff] }
 0x27d   : > { %v1477_v37 = vpop.eup %1476  ;;  %v927_v38 = vpop.permute.xlu1 %926  ;;  %v1015_v23 = vld [vmem:[#allocation2] sm:$0xff] (!%p1319_p2) }
 0x27e   : > { %vm943_vm2 = vcmp.eq.s32.totalorder %v1790_v43, %v927_v38  ;;  %vm944_vm4 = vcmp.eq.s32.totalorder %v1792_v44, %v927_v38  ;;  %976 = vadd.xlane.f32.xlu0 %v975_v14  ;;  %v863_v19 = vadd.f32 %v1477_v37, %v1475_v58  ;;  %v1479_v11 = vpop.eup %1478  ;;  %v895_v37 = vld [vmem:[#allocation4 + $0x20] sm:$0xff]  ;;  %v745_v38 = vld [vmem:[#allocation3 + $0x38] sm:$0xff] }
 0x27f   : > { %v959_v61 = vsel %vm943_vm2, %v1872_v5, 0.0  ;;  %v960_v46 = vsel %vm944_vm4, %v1881_v8, 0.0  ;;  %v1481_v18 = vpop.eup %1480  ;;  %v722_v5 = vmul.f32 1.442695, %v714_v35  ;;  %v892_v8 = vld [vmem:[#allocation4 + $0x8] sm:$0xff] }
 0x280   : > { %864 = vadd.xlane.f32.xlu1 %v863_v19  ;;  %v981_v50 = vadd.f32 %v960_v46, %v959_v61  ;;  %v1483_v56 = vpop.eup %1482  ;;  %v845_v59 = vadd.f32 %v1481_v18, %v1479_v11  ;;  %v742_v11 = vld [vmem:[#allocation3 + $0x20] sm:$0xff] }
 0x281   : > { %v1485_v43 = vpop.eup %1484  ;;  %1490 = vpow2.f32 %v722_v5 }
 0x282   : > { %855 = vadd.xlane.f32.xlu0 %v854_v48  ;;  %v1487_v44 = vpop.eup %1486  ;;  %v848_v20 = vadd.f32 %v1485_v43, %v1483_v56  ;;  %v898_v56 = vld [vmem:[#allocation4 + $0x38] sm:$0xff] }
 0x283   : > { %v1489_v22 = vpop.eup %1488 }
 0x284   : > { %985 = vadd.xlane.f32.xlu1 %v2058_v49  ;;  %v860_v17 = vadd.f32 %v1489_v22, %v1487_v44  ;;  %v732_v49 = vmul.f32 1.442695, %v719_v39 }
 0x286   : > { %846 = vadd.xlane.f32.xlu0 %v845_v59  ;;  %1492 = vpow2.f32 %v732_v49  ;;  %v739_v59 = vld [vmem:[#allocation3 + $0x8] sm:$0xff] }
 0x287   : > { %1494 = vpow2.f32 %v728_v36 }
 0x288   : > { %1496 = vpow2.f32 %v736_v45 }
 0x289   : > { %1498 = vpow2.f32 %v730_v16 }
 0x28a   : > { %849 = vadd.xlane.f32.xlu0 %v848_v20  ;;  %1500 = vpow2.f32 %v724_v24 }
 0x28b   : > { %v1491_v30 = vpop.eup %1490  ;;  %1502 = vpow2.f32 %v726_v34 }
 0x28c   : > { %v746_v63 = vmul.f32 %v1491_v30, %v738_v32  ;;  %1504 = vpow2.f32 %v734_v62  ;;  %v897_v32 = vld [vmem:[#allocation4 + $0x30] sm:$0xff] }
 0x28e   : > { %861 = vadd.xlane.f32.xlu0 %v860_v17 }
 0x290   : > { %v1493_v39 = vpop.eup %1492 }
 0x291   : > { %v751_v47 = vmul.f32 %v1493_v39, %v743_v55  ;;  %v1495_v28 = vpop.eup %1494 }
 0x292   : > { %982 = vadd.xlane.f32.xlu0 %v981_v50  ;;  %v749_v6 = vmul.f32 %v1495_v28, %v741_v13  ;;  %v1497_v58 = vpop.eup %1496 }
 0x293   : > { %v1499_v0 = vpop.eup %1498  ;;  %v753_v46 = vmul.f32 %v1497_v58, %v745_v38  ;;  %v1019_v58 = vld [vmem:[#allocation2 + $0x20] sm:$0xff] (!%p1319_p2) }
 0x294   : > { %v750_v10 = vmul.f32 %v1499_v0, %v742_v11  ;;  %v1501_v25 = vpop.eup %1500 }
 0x295   : > { %v747_v22 = vmul.f32 %v1501_v25, %v739_v59  ;;  %v1503_v17 = vpop.eup %1502  ;;  %v1022_v59 = vld [vmem:[#allocation2 + $0x38] sm:$0xff] (!%p1319_p2) }
 0x2e6   : > { %v968_v21 = vpop.xlane.xlu1 %967 }
 0x2e7   : > { %v988_v60 = vadd.f32 %v968_v21, %v892_v8  ;;  %v740_v8 = vld [vmem:[#allocation3 + $0x10] sm:$0xff] }
 0x2e9   : > { %996 = vst.msk [vmem:[#allocation4 + $0x8] sm:$0xff] %vm874_vm3, %v988_v60  ;;  %v748_v60 = vmul.f32 %v1503_v17, %v740_v8 }
 0x2ea   : > { %v974_v4 = vpop.xlane.xlu1 %973 }
 0x2eb   : > { %v990_v26 = vadd.f32 %v974_v4, %v894_v3  ;;  %v1505_v3 = vpop.eup %1504  ;;  %v744_v4 = vld [vmem:[#allocation3 + $0x30] sm:$0xff] }
 0x2ed   : > { %998 = vst.msk [vmem:[#allocation4 + $0x18] sm:$0xff] %vm874_vm3, %v990_v26 }
 0x2ee   : > { %v980_v29 = vpop.xlane.xlu1 %979 }
 0x2ef   : > { %v992_v35 = vadd.f32 %v980_v29, %v896_v27  ;;  %v752_v27 = vmul.f32 %v1505_v3, %v744_v4 }
 0x2f0   : > { %v1008_v53 = vld [vmem:[#allocation4 + $0x8] sm:$0xff] (!%p1319_p2) }
 0x2f1   : > { %1000 = vst.msk [vmem:[#allocation4 + $0x28] sm:$0xff] %vm874_vm3, %v992_v35 }
 0x2f2   : > { %v844_v54 = vpop.xlane.xlu1 %843 }
 0x2f3   : > { %v866_v7 = vadd.f32 %v844_v54, %v746_v63 }
 0x2f5   : > { %875 = vst.msk [vmem:[#allocation3] sm:$0xff] %vm874_vm3, %v866_v7 }
 0x2fc   : > { %v859_v33 = vpop.xlane.xlu1 %858  ;;  %v1023_v54 = vld [vmem:[#allocation3] sm:$0xff] (!%p1319_p2) }
 0x2fd   : > { %v871_v51 = vadd.f32 %v859_v33, %v751_v47  ;;  %1506 = vlog2.f32 (!%p1319_p2), %v1023_v54 }
 0x2ff   : > { %880 = vst.msk [vmem:[#allocation3 + $0x28] sm:$0xff] %vm874_vm3, %v871_v51  ;;  %v1016_v51 = vld [vmem:[#allocation2 + $0x8] sm:$0xff] (!%p1319_p2) }
 0x303   : > { %v965_v9 = vpop.xlane.xlu0 %964 }
 0x304   : > { %v987_v57 = vadd.f32 %v965_v9, %v891_v52  ;;  %v1017_v9 = vld [vmem:[#allocation2 + $0x10] sm:$0xff] (!%p1319_p2) }
 0x306   : > { %995 = vst.msk [vmem:[#allocation4] sm:$0xff] %vm874_vm3, %v987_v57  ;;  %v1028_v55 = vld [vmem:[#allocation3 + $0x28] sm:$0xff] (!%p1319_p2) }
 0x307   : > { %v971_v15 = vpop.xlane.xlu0 %970  ;;  %v1507_v47 = vpop.eup (!%p1319_p2), %1506 }
 0x308   : > { %v989_v2 = vadd.f32 %v971_v15, %v893_v40  ;;  %v1032_v33 = vmul.f32 (!%p1319_p2), 0.6931472, %v1507_v47  ;;  %v1018_v40 = vld [vmem:[#allocation2 + $0x18] sm:$0xff] (!%p1319_p2) }
 0x309   : > { %v853_v14 = vpop.xlane.xlu1 %852 }
 0x30a   : > { %997 = vst.msk [vmem:[#allocation4 + $0x10] sm:$0xff] %vm874_vm3, %v989_v2  ;;  %v869_v42 = vadd.f32 %v853_v14, %v749_v6  ;;  %v1047_v28 = vadd.f32 (!%p1319_p2), %v1032_v33, %v1015_v23 }
 0x30b   : > { %v977_v19 = vpop.xlane.xlu0 %976 }
 0x30c   : > { %878 = vst.msk [vmem:[#allocation3 + $0x18] sm:$0xff] %vm874_vm3, %v869_v42  ;;  %v991_v61 = vadd.f32 %v977_v19, %v895_v37  ;;  %v1010_v37 = vld [vmem:[#allocation4 + $0x18] sm:$0xff] (!%p1319_p2)  ;;  %v1020_v42 = vld [vmem:[#allocation2 + $0x28] sm:$0xff] (!%p1319_p2) }
 0x30d   : > { %v865_v18 = vpop.xlane.xlu1 %864  ;;  %v1007_v24 = vld [vmem:[#allocation4] sm:$0xff] (!%p1319_p2) }
 0x30e   : > { %999 = vst.msk [vmem:[#allocation4 + $0x20] sm:$0xff] %vm874_vm3, %v991_v61  ;;  %v873_v48 = vadd.f32 %v865_v18, %v753_v46  ;;  %v1055_v62 = vsub.f32 (!%p1319_p2), %v1007_v24, %v1047_v28  ;;  %v1021_v18 = vld [vmem:[#allocation2 + $0x30] sm:$0xff] (!%p1319_p2) }
 0x30f   : > { %v856_v50 = vpop.xlane.xlu0 %855 }
 0x310   : > { %882 = vst.msk [vmem:[#allocation3 + $0x38] sm:$0xff] %vm874_vm3, %v873_v48  ;;  %v870_v43 = vadd.f32 %v856_v50, %v750_v10  ;;  %1063 = vst.msk [vmem:[%s1738_s15] sm:$0xff] (!%p1319_p2), %vm874_vm3, %v1055_v62  ;;  %v1012_v50 = vld [vmem:[#allocation4 + $0x28] sm:$0xff] (!%p1319_p2) }
 0x311   : > { %v986_v44 = vpop.xlane.xlu1 %985  ;;  %v1009_v2 = vld [vmem:[#allocation4 + $0x10] sm:$0xff] (!%p1319_p2) }
 0x312   : > { %879 = vst.msk [vmem:[#allocation3 + $0x20] sm:$0xff] %vm874_vm3, %v870_v43  ;;  %v994_v20 = vadd.f32 %v986_v44, %v898_v56 }
 0x313   : > { %v847_v5 = vpop.xlane.xlu0 %846  ;;  %v1026_v36 = vld [vmem:[#allocation3 + $0x18] sm:$0xff] (!%p1319_p2) }
 0x314   : > { %1002 = vst.msk [vmem:[#allocation4 + $0x38] sm:$0xff] %vm874_vm3, %v994_v20  ;;  %v867_v21 = vadd.f32 %v847_v5, %v747_v22 }
 0x315   : > { %v1011_v61 = vld [vmem:[#allocation4 + $0x20] sm:$0xff] (!%p1319_p2) }
 0x316   : > { %876 = vst.msk [vmem:[#allocation3 + $0x8] sm:$0xff] %vm874_vm3, %v867_v21 }
 0x317   : > { %v850_v49 = vpop.xlane.xlu0 %849  ;;  %v1030_v45 = vld [vmem:[#allocation3 + $0x38] sm:$0xff] (!%p1319_p2) }
 0x318   : > { %v868_v26 = vadd.f32 %v850_v49, %v748_v60 }
 0x319   : > { %v1027_v39 = vld [vmem:[#allocation3 + $0x20] sm:$0xff] (!%p1319_p2) }
 0x31a   : > { %877 = vst.msk [vmem:[#allocation3 + $0x10] sm:$0xff] %vm874_vm3, %v868_v26 }
 0x31b   : > { %v862_v30 = vpop.xlane.xlu0 %861  ;;  %v1014_v8 = vld [vmem:[#allocation4 + $0x38] sm:$0xff] (!%p1319_p2) }
 0x31c   : > { %v872_v29 = vadd.f32 %v862_v30, %v752_v27  ;;  %1006 = sbr.rel (%p1319_p2) target bundleno = 825 (0x339), region = 78 }
 0x31d   : > { %v1024_v7 = vld [vmem:[#allocation3 + $0x8] sm:$0xff] (!%p1319_p2) }
 0x31e   : > { %881 = vst.msk [vmem:[#allocation3 + $0x30] sm:$0xff] %vm874_vm3, %v872_v29  ;;  %1508 = vlog2.f32 (!%p1319_p2), %v1024_v7 }
 0x31f   : > { %v983_v35 = vpop.xlane.xlu0 %982 }
 0x320   : > { %v993_v63 = vadd.f32 %v983_v35, %v897_v32 }
 0x321   : > { %v1025_v31 = vld [vmem:[#allocation3 + $0x10] sm:$0xff] (!%p1319_p2) }
 0x322   : > { %1001 = vst.msk [vmem:[#allocation4 + $0x30] sm:$0xff] %vm874_vm3, %v993_v63  ;;  %1510 = vlog2.f32 (!%p1319_p2), %v1025_v31 }
 0x323   : > { %1512 = vlog2.f32 %v1026_v36 }
 0x324   : > { %1514 = vlog2.f32 %v1027_v39 }
 0x325   : > { %1516 = vlog2.f32 %v1028_v55  ;;  %v1029_v12 = vld [vmem:[#allocation3 + $0x30] sm:$0xff] }
 0x326   : > { %1518 = vlog2.f32 %v1029_v12 }
 0x327   : > { %1520 = vlog2.f32 %v1030_v45 }
 0x328   : > { %v1509_v16 = vpop.eup %1508 }
 0x329   : > { %v1034_v52 = vmul.f32 0.6931472, %v1509_v16  ;;  %v1013_v20 = vld [vmem:[#allocation4 + $0x30] sm:$0xff] }
 0x32b   : > { %v1048_v15 = vadd.f32 %v1034_v52, %v1016_v51 }
 0x32c   : > { %v1511_v1 = vpop.eup %1510 }
 0x32d   : > { %v1513_v57 = vpop.eup %1512  ;;  %v1036_v34 = vmul.f32 0.6931472, %v1511_v1  ;;  %v1056_v19 = vsub.f32 %v1008_v53, %v1048_v15 }
 0x32e   : > { %v1515_v13 = vpop.eup %1514  ;;  %v1038_v6 = vmul.f32 0.6931472, %v1513_v57 }
 0x32f   : > { %v1517_v41 = vpop.eup %1516  ;;  %v1049_v14 = vadd.f32 %v1036_v34, %v1017_v9  ;;  %v1040_v38 = vmul.f32 0.6931472, %v1515_v13  ;;  %1064 = vst.msk [vmem:[%s1738_s15 + $0x8] sm:$0xff] %vm874_vm3, %v1056_v19 }
 0x330   : > { %v1519_v0 = vpop.eup %1518  ;;  %v1050_v11 = vadd.f32 %v1038_v6, %v1018_v40  ;;  %v1042_v46 = vmul.f32 0.6931472, %v1517_v41 }
 0x331   : > { %v1521_v48 = vpop.eup %1520  ;;  %v1057_v10 = vsub.f32 %v1009_v2, %v1049_v14  ;;  %v1051_v25 = vadd.f32 %v1040_v38, %v1019_v58  ;;  %v1044_v56 = vmul.f32 0.6931472, %v1519_v0 }
 0x332   : > { %v1058_v43 = vsub.f32 %v1010_v37, %v1050_v11  ;;  %v1052_v44 = vadd.f32 %v1042_v46, %v1020_v42  ;;  %v1046_v22 = vmul.f32 0.6931472, %v1521_v48 }
 0x333   : > { %1065 = vst.msk [vmem:[%s1738_s15 + $0x10] sm:$0xff] %vm874_vm3, %v1057_v10  ;;  %v1059_v17 = vsub.f32 %v1011_v61, %v1051_v25  ;;  %v1053_v5 = vadd.f32 %v1044_v56, %v1021_v18 }
 0x334   : > { %1066 = vst.msk [vmem:[%s1738_s15 + $0x18] sm:$0xff] %vm874_vm3, %v1058_v43  ;;  %v1060_v21 = vsub.f32 %v1012_v50, %v1052_v44  ;;  %v1054_v60 = vadd.f32 %v1046_v22, %v1022_v59 }
 0x335   : > { %1067 = vst.msk [vmem:[%s1738_s15 + $0x20] sm:$0xff] %vm874_vm3, %v1059_v17  ;;  %v1061_v3 = vsub.f32 %v1013_v20, %v1053_v5 }
 0x336   : > { %1068 = vst.msk [vmem:[%s1738_s15 + $0x28] sm:$0xff] %vm874_vm3, %v1060_v21  ;;  %v1062_v49 = vsub.f32 %v1014_v8, %v1054_v60 }
 0x337   : > { %1069 = vst.msk [vmem:[%s1738_s15 + $0x30] sm:$0xff] %vm874_vm3, %v1061_v3 }
 0x338   : > { %1070 = vst.msk [vmem:[%s1738_s15 + $0x38] sm:$0xff] %vm874_vm3, %v1062_v49 }
 0x339 PF: > { %1082 = sbr.rel (!%p1689_p9) target bundleno = 834 (0x342), region = 82  ;;  %s1322_s2 = sshll.u32 (%p1689_p9), %s1576_s19, 1  ;;  %v1130_v4 = vld [vmem:[%s1742_s28] sm:$0xff] (%p1689_p9)  ;;  %v1132_v26 = vld [vmem:[%s1742_s28 + $0x8] sm:$0xff] (%p1689_p9)  ;;  %v1134_v27 = vld [vmem:[%s1742_s28 + $0x10] sm:$0xff] (%p1689_p9) }
 0x33a   : > { %s1336_s29 = sshll.u32 (%p1689_p9), %s1580_s20, 5  ;;  %v1136_v30 = vld [vmem:[%s1742_s28 + $0x18] sm:$0xff] (%p1689_p9)  ;;  %v1138_v29 = vld [vmem:[%s1742_s28 + $0x20] sm:$0xff] (%p1689_p9)  ;;  %v1140_v32 = vld [vmem:[%s1742_s28 + $0x28] sm:$0xff] (%p1689_p9) }
 0x33b   : > { %s1086_s5 = sadd.s32 (%p1689_p9), %s1336_s29, %s1322_s2  ;;  %v1142_v35 = vld [vmem:[%s1742_s28 + $0x30] sm:$0xff] (%p1689_p9)  ;;  %v1144_v63 = vld [vmem:[%s1742_s28 + $0x38] sm:$0xff] (%p1689_p9) }
 0x33c   : > { %s1324_s7 = sshll.u32 (%p1689_p9), %s1086_s5, 2 }
 0x33d   : > { %s1088_s10 = scalar_lea.vmem (%p1689_p9), %s2193_s3, %s1324_s7 }
 0x33e   : > { %1131 = vst [vmem:[%s1088_s10] sm:$0xff] (%p1689_p9), %v1130_v4  ;;  %1133 = vst [vmem:[%s1088_s10 + $0x10] sm:$0xff] (%p1689_p9), %v1132_v26 }
 0x33f   : > { %1135 = vst [vmem:[%s1088_s10 + $0x20] sm:$0xff] (%p1689_p9), %v1134_v27  ;;  %1137 = vst [vmem:[%s1088_s10 + $0x30] sm:$0xff] (%p1689_p9), %v1136_v30 }
 0x340   : > { %1139 = vst [vmem:[%s1088_s10 + $0x40] sm:$0xff] %v1138_v29  ;;  %1141 = vst [vmem:[%s1088_s10 + $0x50] sm:$0xff] %v1140_v32 }
 0x341   : > { %1143 = vst [vmem:[%s1088_s10 + $0x60] sm:$0xff] %v1142_v35  ;;  %1145 = vst [vmem:[%s1088_s10 + $0x70] sm:$0xff] %v1144_v63 }
 0x342 PF: > { %s15_s23 = sadd.s32 1, %s1592_s23   ;;  %s2206_s11 = sld [smem:[#allocation7_spill]] }
 0x343   : > { %p12_p3 = scmp.ge.s32.totalorder %s15_s23, 6   ;;  %s2207_s15 = smov %s1564_s16 }
 0x344   : > { %s2208_s16 = smov %s1694_s8  ;;  %s2209_s17 = smov %s1572_s18 }
 0x345   : > { %s2210_s18 = smov %s1683_s30  ;;  %s2211_s19 = smov %s1584_s21 }
 0x346   : > { %s2212_s20 = smov %s1588_s22  ;;  %s2213_s21 = smov %s2216_s25 }
 0x347   :  { %14 = sbr.rel (!%p12_p3) target bundleno = 7 (0x7), region = 169 }
 0x348   : > { %s2214_s22 = smov %s2206_s11 }

</bundles_post_ra>
